<compile_context>
chip_gen: v7x
topology: tpu7x:2x2x1
jax: 0.10.0
libtpu: 0.0.40
codegen_flags: <defaults>
</compile_context>

<pallas_src>
import jax
import jax.numpy as jnp
from jax.experimental import pallas as pl
from jax.experimental.pallas import tpu as pltpu

EPS = 1e-8            # torch.cosine_similarity default eps
PT_MAX = 16384        # max pixel-block width (lanes) per grid step
CHUNK = 1024          # in-kernel sub-chunk width (bounds vreg pressure)

_NT_DIMS = (((1,), (1,)), ((), ()))   # contract the last (pixel) dim of both operands


def _fold128(x):
    """(K, W) -> (K, 128): tree-add the W/128 lane chunks (pure VPU adds)."""
    width = x.shape[1]
    parts = [x[:, i * 128:(i + 1) * 128] for i in range(width // 128)]
    while len(parts) > 1:
        nxt = [parts[i] + parts[i + 1] for i in range(0, len(parts) - 1, 2)]
        if len(parts) % 2 == 1:
            nxt.append(parts[-1])
        parts = nxt
    return parts[0]


def _make_kernel(K, P, Pt):
    need_tail_mask = (P % Pt) != 0
    # static sub-chunk (offset, width) pairs inside one Pt-wide block
    chunks = []
    off = 0
    while off < Pt:
        cw = min(CHUNK, Pt - off)
        chunks.append((off, cw))
        off += cw

    def kernel(lse_ref, est_ref, gt_ref, mask_ref, param_ref, cos_ref,
               slse_acc, sest_acc, cnt_acc, l1_acc):
        pj = pl.program_id(1)

        # ---- reset per-instance accumulators at the start of each batch elem ----
        @pl.when(pj == 0)
        def _():
            slse_acc[...] = jnp.zeros_like(slse_acc)
            sest_acc[...] = jnp.zeros_like(sest_acc)
            cnt_acc[...] = jnp.zeros_like(cnt_acc)
            l1_acc[...] = jnp.zeros_like(l1_acc)

        gt = gt_ref[0].astype(jnp.float32)                    # (K, 3)
        g0, g1, g2 = gt[:, 0:1], gt[:, 1:2], gt[:, 2:3]       # (K, 1)

        base = pj * Pt

        sl_tot = jnp.zeros((K, 3), jnp.float32)
        se_tot = jnp.zeros((K, 3), jnp.float32)
        cnt_tot = jnp.zeros((K, 128), jnp.float32)
        l1_tot = jnp.zeros((K, 128), jnp.float32)

        for coff, cw in chunks:
            lse = lse_ref[0, :, pl.ds(coff, cw)].astype(jnp.float32)   # (3, cw)
            est = est_ref[0, :, pl.ds(coff, cw)].astype(jnp.float32)   # (3, cw)
            mvalid = mask_ref[0, :, pl.ds(coff, cw)] > 0               # (K, cw)

            if need_tail_mask:
                # ragged last block: scrub garbage lanes instead of wrapper padding
                lane = jax.lax.broadcasted_iota(jnp.int32, (1, cw), 1)
                valid = (base + (coff + lane)) < P                     # (1, cw)
                lse = jnp.where(valid, lse, 0.0)
                est = jnp.where(valid, est, 0.0)
                mvalid = jnp.logical_and(valid, mvalid)

            m = mvalid.astype(jnp.float32)                             # (K, cw)

            lse0, lse1, lse2 = lse[0:1, :], lse[1:2, :], lse[2:3, :]
            est0, est1, est2 = est[0:1, :], est[1:2, :], est[2:3, :]

            # 1/max(||.||, eps) == rsqrt(max(||.||^2, eps^2))  (fused, EUP slot)
            inv_lse = jax.lax.rsqrt(
                jnp.maximum(lse0 * lse0 + lse1 * lse1 + lse2 * lse2, EPS * EPS))
            inv_est = jax.lax.rsqrt(
                jnp.maximum(est0 * est0 + est1 * est1 + est2 * est2, EPS * EPS))
            nl = lse * inv_lse                                         # (3, cw)
            ne = est * inv_est                                         # (3, cw)

            # MXU: masked per-instance sums of the normalized vectors (f32 operands).
            sl_tot = sl_tot + jax.lax.dot_general(
                m, nl, _NT_DIMS, precision=jax.lax.Precision.HIGHEST,
                preferred_element_type=jnp.float32)                    # (K, 3)
            se_tot = se_tot + jax.lax.dot_general(
                m, ne, _NT_DIMS, precision=jax.lax.Precision.HIGHEST,
                preferred_element_type=jnp.float32)                    # (K, 3)

            # VPU: masked L1 and valid-pixel count as 128-lane partial sums.
            l1 = (jnp.abs(est0 - g0) + jnp.abs(est1 - g1) + jnp.abs(est2 - g2))
            l1_tot = l1_tot + _fold128(m * l1)
            cnt_tot = cnt_tot + _fold128(m)

        slse_acc[...] += sl_tot
        sest_acc[...] += se_tot
        cnt_acc[...] += cnt_tot
        l1_acc[...] += l1_tot

        # ---- finalize per batch element on the last pixel block ----
        @pl.when(pj == pl.num_programs(1) - 1)
        def _():
            cnt = jnp.sum(cnt_acc[...], axis=1, keepdims=True)          # (K, 1)
            l1s = jnp.sum(l1_acc[...], axis=1, keepdims=True)           # (K, 1)
            slse = jnp.sum(slse_acc[...] * gt, axis=1, keepdims=True)   # (K, 1)
            sest = jnp.sum(sest_acc[...] * gt, axis=1, keepdims=True)   # (K, 1)

            has = cnt > 0.0
            inv_cnt = pl.reciprocal(jnp.maximum(cnt, 1.0))
            inv_gt = jax.lax.rsqrt(
                jnp.maximum(g0 * g0 + g1 * g1 + g2 * g2, EPS * EPS))    # (K, 1)

            param_k = jnp.where(has, l1s * inv_cnt, 0.0)
            lse_mean = slse * inv_cnt * inv_gt
            est_mean = sest * inv_cnt * inv_gt
            sim_k = jnp.where(jnp.logical_and(has, lse_mean > est_mean),
                              lse_mean - est_mean, 0.0)

            count = jnp.sum(has.astype(jnp.float32), axis=0, keepdims=True)  # (1,1)
            inv_count = pl.reciprocal(jnp.maximum(count, 1.0))
            param_b = jnp.where(count > 0.0,
                                jnp.sum(param_k, axis=0, keepdims=True) * inv_count,
                                0.0)
            cos_b = jnp.where(count > 0.0,
                              jnp.sum(sim_k, axis=0, keepdims=True) * inv_count,
                              0.0)

            # lane-dense per-batch outputs (unmasked full-row stores)
            param_ref[...] = jnp.broadcast_to(param_b.reshape(1, 1, 1), (1, 1, 128))
            cos_ref[...] = jnp.broadcast_to(cos_b.reshape(1, 1, 1), (1, 1, 128))

    return kernel


def plane_loss(plane_lse, plane_est, plane_gt, ins_mask, *, pt_max=PT_MAX):
    """plane_lse/plane_est: (n,3,h,w); plane_gt: (n,K,3); ins_mask: (n,K,h,w)."""
    n, c, h, w = plane_lse.shape
    assert c == 3
    K = ins_mask.shape[1]
    P = h * w

    # free reshapes only — no padding copies, mask stays in its native dtype
    lse = plane_lse.reshape(n, 3, P)
    est = plane_est.reshape(n, 3, P)
    msk = ins_mask.reshape(n, K, P)

    p128 = ((P + 127) // 128) * 128
    Pt = min(p128, pt_max)
    n_pj = pl.cdiv(P, Pt)

    kernel = _make_kernel(K=K, P=P, Pt=Pt)

    param_o, cos_o = pl.pallas_call(
        kernel,
        out_shape=(jax.ShapeDtypeStruct((n, 1, 128), jnp.float32),
                   jax.ShapeDtypeStruct((n, 1, 128), jnp.float32)),
        grid_spec=pltpu.PrefetchScalarGridSpec(
            num_scalar_prefetch=0,
            grid=(n, n_pj),
            in_specs=[
                pl.BlockSpec((1, 3, Pt), lambda b, pj: (b, 0, pj)),    # lse
                pl.BlockSpec((1, 3, Pt), lambda b, pj: (b, 0, pj)),    # est
                pl.BlockSpec((1, K, 3), lambda b, pj: (b, 0, 0)),      # gt (per-b)
                pl.BlockSpec((1, K, Pt), lambda b, pj: (b, 0, pj)),    # mask
            ],
            out_specs=[
                pl.BlockSpec((1, 1, 128), lambda b, pj: (b, 0, 0)),
                pl.BlockSpec((1, 1, 128), lambda b, pj: (b, 0, 0)),
            ],
            scratch_shapes=[
                pltpu.VMEM((K, 3), jnp.float32),    # sum_p m * lse/||lse||
                pltpu.VMEM((K, 3), jnp.float32),    # sum_p m * est/||est||
                pltpu.VMEM((K, 128), jnp.float32),  # valid-pixel count (lane partials)
                pltpu.VMEM((K, 128), jnp.float32),  # masked L1 sum (lane partials)
            ],
        ),
        compiler_params=pltpu.CompilerParams(
            dimension_semantics=("parallel", "arbitrary")),
    )(lse, est, plane_gt, msk)

    # final mean over the batch in the wrapper (== sum / n of the module)
    return jnp.mean(param_o[:, 0, 0]), jnp.mean(cos_o[:, 0, 0])


def plane_loss_ref(plane_lse, plane_est, plane_gt, ins_mask):
    """Pure-JAX reference (same math as the PyTorch module)."""
    n, _, h, w = plane_lse.shape
    K = ins_mask.shape[1]
    P = h * w
    lse = plane_lse.reshape(n, 3, P).astype(jnp.float32)
    est = plane_est.reshape(n, 3, P).astype(jnp.float32)
    gt = plane_gt.astype(jnp.float32)
    msk = ins_mask.reshape(n, K, P)

    m = (msk > 0).astype(jnp.float32)                 # (n,K,P)
    cnt = m.sum(-1)                                   # (n,K)
    has = cnt > 0
    safe = jnp.maximum(cnt, 1.0)
    gt_e = gt[:, :, :, None]                          # (n,K,3,1)

    l1 = jnp.abs(est[:, None] - gt_e).sum(2)          # (n,K,P)
    param_k = jnp.where(has, (l1 * m).sum(-1) / safe, 0.0)

    dot_lse = (gt_e * lse[:, None]).sum(2)
    dot_est = (gt_e * est[:, None]).sum(2)
    lse_n = jnp.maximum(jnp.sqrt((lse ** 2).sum(1)), EPS)[:, None]       # (n,1,P)
    est_n = jnp.maximum(jnp.sqrt((est ** 2).sum(1)), EPS)[:, None]
    gt_n = jnp.maximum(jnp.sqrt((gt ** 2).sum(-1)), EPS)[:, :, None]     # (n,K,1)
    cos_lse = dot_lse / (gt_n * lse_n)
    cos_est = dot_est / (gt_n * est_n)
    lse_mean = (cos_lse * m).sum(-1) / safe
    est_mean = (cos_est * m).sum(-1) / safe
    sim_k = jnp.where(has & (lse_mean > est_mean), lse_mean - est_mean, 0.0)

    count = has.sum(-1).astype(jnp.float32)           # (n,)
    sc = jnp.maximum(count, 1.0)
    pb = jnp.where(count > 0, param_k.sum(-1) / sc, 0.0)
    cb = jnp.where(count > 0, sim_k.sum(-1) / sc, 0.0)
    return pb.mean(), cb.mean()


if __name__ == "__main__":
    def make_inputs(key, n, K, h, w, empty_batch=None):
        k1, k2, k3, k4 = jax.random.split(key, 4)
        plane_lse = jax.random.normal(k1, (n, 3, h, w), dtype=jnp.float32)
        plane_est = jax.random.normal(k2, (n, 3, h, w), dtype=jnp.float32)
        gt_raw = jax.random.normal(k3, (n, K, 3), dtype=jnp.float32)
        plane_gt = gt_raw / jnp.linalg.norm(gt_raw, axis=-1, keepdims=True)
        # Sparse binary masks; instances >= 12 have no valid pixels so the
        # per-instance count branch is exercised.
        mask_raw = (jax.random.uniform(k4, (n, K, h, w)) > 0.7).astype(jnp.float32)
        keep = (jnp.arange(K) < 12).astype(jnp.float32)[None, :, None, None]
        ins_mask = mask_raw * keep
        if empty_batch is not None:
            ins_mask = ins_mask.at[empty_batch].set(0.0)   # count==0 batch element
        return plane_lse, plane_est, plane_gt, ins_mask

    key = jax.random.PRNGKey(0)
    k_base, k_ragged, k_multi = jax.random.split(key, 3)

    cases = [
        # (name, inputs, pt_max)
        ("base 16x16", make_inputs(k_base, n=2, K=20, h=16, w=16), PT_MAX),
        # ragged pixel block + multi sub-chunk path (P=1600 -> Pt=1664: 1024+640)
        ("ragged 40x40", make_inputs(k_ragged, n=1, K=20, h=40, w=40), PT_MAX),
        # multi grid-step accumulation over pixels + an all-empty batch element
        ("multi-step 16x16", make_inputs(k_multi, n=2, K=20, h=16, w=16,
                                         empty_batch=1), 128),
    ]

    for name, (p_lse, p_est, p_gt, i_msk), pt_max in cases:
        param_loss, cosine_loss = plane_loss(p_lse, p_est, p_gt, i_msk,
                                             pt_max=pt_max)
        jax.block_until_ready((param_loss, cosine_loss))
        ref_param, ref_cos = plane_loss_ref(p_lse, p_est, p_gt, i_msk)
        assert jnp.allclose(param_loss, ref_param, rtol=1e-5, atol=1e-5), (
            name, param_loss, ref_param)
        assert jnp.allclose(cosine_loss, ref_cos, rtol=1e-5, atol=1e-5), (
            name, cosine_loss, ref_cos)

    print("KERNEL_OK")
</pallas_src>

<mosaic_0001>
module attributes {stable_mosaic.version = 11 : i64} {
  func.func @kernel(%arg0: i32, %arg1: i32, %arg2: memref<1x3x256xf32, #tpu.memory_space<vmem>>, %arg3: memref<1x3x256xf32, #tpu.memory_space<vmem>>, %arg4: memref<1x20x3xf32, #tpu.memory_space<vmem>>, %arg5: memref<1x20x256xf32, #tpu.memory_space<vmem>>, %arg6: memref<1x1x128xf32, #tpu.memory_space<vmem>>, %arg7: memref<1x1x128xf32, #tpu.memory_space<vmem>>, %arg8: memref<20x3xf32, #tpu.memory_space<vmem>>, %arg9: memref<20x3xf32, #tpu.memory_space<vmem>>, %arg10: memref<20x128xf32, #tpu.memory_space<vmem>>, %arg11: memref<20x128xf32, #tpu.memory_space<vmem>>) attributes {dimension_semantics = [#tpu.dimension_semantics<parallel>, #tpu.dimension_semantics<arbitrary>], iteration_bounds = array<i64: 2, 1>, scalar_prefetch = 0 : i64, scratch_operands = 4 : i64, tpu.core_type = #tpu.core_type<tc>, window_params = [{transform_indices = @transform_0, window_bounds = array<i64: 1, 3, 256>}, {transform_indices = @transform_1, window_bounds = array<i64: 1, 3, 256>}, {transform_indices = @transform_2, window_bounds = array<i64: 1, 20, 3>}, {transform_indices = @transform_3, window_bounds = array<i64: 1, 20, 256>}, {transform_indices = @transform_4, window_bounds = array<i64: 1, 1, 128>}, {transform_indices = @transform_5, window_bounds = array<i64: 1, 1, 128>}]} {
    %c0_i32 = arith.constant 0 : i32
    %0 = arith.cmpi eq, %arg1, %c0_i32 : i32
    %1 = arith.extui %0 : i1 to i32
    %c0_i32_0 = arith.constant 0 : i32
    %2 = arith.cmpi ne, %1, %c0_i32_0 : i32
    scf.if %2 {
      %cst_38 = arith.constant 0.000000e+00 : f32
      %90 = vector.broadcast %cst_38 : f32 to vector<20x3xf32>
      %c0_39 = arith.constant 0 : index
      %c0_40 = arith.constant 0 : index
      %91 = vector.load %arg8[%c0_39, %c0_40] : memref<20x3xf32, #tpu.memory_space<vmem>>, vector<20x3xf32>
      tpu.vector_store %arg8[%c0_39, %c0_40], %90 {strides = array<i32>} : memref<20x3xf32, #tpu.memory_space<vmem>>, vector<20x3xf32>,
      %cst_41 = arith.constant 0.000000e+00 : f32
      %92 = vector.broadcast %cst_41 : f32 to vector<20x3xf32>
      %c0_42 = arith.constant 0 : index
      %c0_43 = arith.constant 0 : index
      %93 = vector.load %arg9[%c0_42, %c0_43] : memref<20x3xf32, #tpu.memory_space<vmem>>, vector<20x3xf32>
      tpu.vector_store %arg9[%c0_42, %c0_43], %92 {strides = array<i32>} : memref<20x3xf32, #tpu.memory_space<vmem>>, vector<20x3xf32>,
      %cst_44 = arith.constant 0.000000e+00 : f32
      %94 = vector.broadcast %cst_44 : f32 to vector<20x128xf32>
      %c0_45 = arith.constant 0 : index
      %c0_46 = arith.constant 0 : index
      %95 = vector.load %arg10[%c0_45, %c0_46] : memref<20x128xf32, #tpu.memory_space<vmem>>, vector<20x128xf32>
      tpu.vector_store %arg10[%c0_45, %c0_46], %94 {strides = array<i32>} : memref<20x128xf32, #tpu.memory_space<vmem>>, vector<20x128xf32>,
      %cst_47 = arith.constant 0.000000e+00 : f32
      %96 = vector.broadcast %cst_47 : f32 to vector<20x128xf32>
      %c0_48 = arith.constant 0 : index
      %c0_49 = arith.constant 0 : index
      %97 = vector.load %arg11[%c0_48, %c0_49] : memref<20x128xf32, #tpu.memory_space<vmem>>, vector<20x128xf32>
      tpu.vector_store %arg11[%c0_48, %c0_49], %96 {strides = array<i32>} : memref<20x128xf32, #tpu.memory_space<vmem>>, vector<20x128xf32>,
    } else {
    }
    %c0 = arith.constant 0 : index
    %c0_1 = arith.constant 0 : index
    %c0_2 = arith.constant 0 : index
    %3 = vector.load %arg4[%c0, %c0_1, %c0_2] : memref<1x20x3xf32, #tpu.memory_space<vmem>>, vector<1x20x3xf32>
    %4 = vector.shape_cast %3 : vector<1x20x3xf32> to vector<20x3xf32>
    %5 = vector.extract_strided_slice %4 {offsets = [0, 0], sizes = [20, 1], strides = [1, 1]} : vector<20x3xf32> to vector<20x1xf32>
    %6 = vector.extract_strided_slice %4 {offsets = [0, 1], sizes = [20, 1], strides = [1, 1]} : vector<20x3xf32> to vector<20x1xf32>
    %7 = vector.extract_strided_slice %4 {offsets = [0, 2], sizes = [20, 1], strides = [1, 1]} : vector<20x3xf32> to vector<20x1xf32>
    %cst = arith.constant 0.000000e+00 : f32
    %8 = vector.broadcast %cst : f32 to vector<20x3xf32>
    %cst_3 = arith.constant 0.000000e+00 : f32
    %9 = vector.broadcast %cst_3 : f32 to vector<20x3xf32>
    %cst_4 = arith.constant 0.000000e+00 : f32
    %10 = vector.broadcast %cst_4 : f32 to vector<20x128xf32>
    %cst_5 = arith.constant 0.000000e+00 : f32
    %11 = vector.broadcast %cst_5 : f32 to vector<20x128xf32>
    %c0_6 = arith.constant 0 : index
    %c0_7 = arith.constant 0 : index
    %c0_8 = arith.constant 0 : index
    %12 = vector.load %arg2[%c0_6, %c0_7, %c0_8] : memref<1x3x256xf32, #tpu.memory_space<vmem>>, vector<1x3x256xf32>
    %13 = vector.shape_cast %12 : vector<1x3x256xf32> to vector<3x256xf32>
    %c0_9 = arith.constant 0 : index
    %c0_10 = arith.constant 0 : index
    %c0_11 = arith.constant 0 : index
    %14 = vector.load %arg3[%c0_9, %c0_10, %c0_11] : memref<1x3x256xf32, #tpu.memory_space<vmem>>, vector<1x3x256xf32>
    %15 = vector.shape_cast %14 : vector<1x3x256xf32> to vector<3x256xf32>
    %c0_12 = arith.constant 0 : index
    %c0_13 = arith.constant 0 : index
    %c0_14 = arith.constant 0 : index
    %16 = vector.load %arg5[%c0_12, %c0_13, %c0_14] : memref<1x20x256xf32, #tpu.memory_space<vmem>>, vector<1x20x256xf32>
    %17 = vector.shape_cast %16 : vector<1x20x256xf32> to vector<20x256xf32>
    %cst_15 = arith.constant 0.000000e+00 : f32
    %18 = vector.broadcast %cst_15 : f32 to vector<20x256xf32>
    %19 = arith.cmpf ogt, %17, %18 : vector<20x256xf32>
    %20 = arith.extui %19 : vector<20x256xi1> to vector<20x256xi32>
    %21 = arith.sitofp %20 : vector<20x256xi32> to vector<20x256xf32>
    %22 = vector.extract_strided_slice %13 {offsets = [0, 0], sizes = [1, 256], strides = [1, 1]} : vector<3x256xf32> to vector<1x256xf32>
    %23 = vector.extract_strided_slice %13 {offsets = [1, 0], sizes = [1, 256], strides = [1, 1]} : vector<3x256xf32> to vector<1x256xf32>
    %24 = vector.extract_strided_slice %13 {offsets = [2, 0], sizes = [1, 256], strides = [1, 1]} : vector<3x256xf32> to vector<1x256xf32>
    %25 = vector.extract_strided_slice %15 {offsets = [0, 0], sizes = [1, 256], strides = [1, 1]} : vector<3x256xf32> to vector<1x256xf32>
    %26 = vector.extract_strided_slice %15 {offsets = [1, 0], sizes = [1, 256], strides = [1, 1]} : vector<3x256xf32> to vector<1x256xf32>
    %27 = vector.extract_strided_slice %15 {offsets = [2, 0], sizes = [1, 256], strides = [1, 1]} : vector<3x256xf32> to vector<1x256xf32>
    %28 = arith.mulf %22, %22 : vector<1x256xf32>
    %29 = arith.mulf %23, %23 : vector<1x256xf32>
    %30 = arith.addf %28, %29 : vector<1x256xf32>
    %31 = arith.mulf %24, %24 : vector<1x256xf32>
    %32 = arith.addf %30, %31 : vector<1x256xf32>
    %cst_16 = arith.constant 1.000000e-16 : f32
    %33 = vector.broadcast %cst_16 : f32 to vector<1x256xf32>
    %34 = arith.maximumf %32, %33 : vector<1x256xf32>
    %35 = math.rsqrt %34 : vector<1x256xf32>
    %36 = arith.mulf %25, %25 : vector<1x256xf32>
    %37 = arith.mulf %26, %26 : vector<1x256xf32>
    %38 = arith.addf %36, %37 : vector<1x256xf32>
    %39 = arith.mulf %27, %27 : vector<1x256xf32>
    %40 = arith.addf %38, %39 : vector<1x256xf32>
    %cst_17 = arith.constant 1.000000e-16 : f32
    %41 = vector.broadcast %cst_17 : f32 to vector<1x256xf32>
    %42 = arith.maximumf %40, %41 : vector<1x256xf32>
    %43 = math.rsqrt %42 : vector<1x256xf32>
    %44 = vector.broadcast %35 : vector<1x256xf32> to vector<3x256xf32>
    %45 = arith.mulf %13, %44 : vector<3x256xf32>
    %46 = vector.broadcast %43 : vector<1x256xf32> to vector<3x256xf32>
    %47 = arith.mulf %15, %46 : vector<3x256xf32>
    %cst_18 = arith.constant dense<0.000000e+00> : vector<20x3xf32>
    %48 = tpu.matmul %21, %45, %cst_18 {dimension_numbers = #tpu.dot_dimension_numbers<[1], [1], [0], [0], [0, 0, 1, 0], [], []>, precision = #tpu.contract_precision<fp32>} : vector<20x256xf32>, vector<3x256xf32>, vector<20x3xf32> -> vector<20x3xf32>
    %49 = arith.addf %8, %48 : vector<20x3xf32>
    %cst_19 = arith.constant dense<0.000000e+00> : vector<20x3xf32>
    %50 = tpu.matmul %21, %47, %cst_19 {dimension_numbers = #tpu.dot_dimension_numbers<[1], [1], [0], [0], [0, 0, 1, 0], [], []>, precision = #tpu.contract_precision<fp32>} : vector<20x256xf32>, vector<3x256xf32>, vector<20x3xf32> -> vector<20x3xf32>
    %51 = arith.addf %9, %50 : vector<20x3xf32>
    %52 = vector.broadcast %25 : vector<1x256xf32> to vector<20x256xf32>
    %53 = vector.broadcast %5 : vector<20x1xf32> to vector<20x256xf32>
    %54 = arith.subf %52, %53 : vector<20x256xf32>
    %55 = math.absf %54 : vector<20x256xf32>
    %56 = vector.broadcast %26 : vector<1x256xf32> to vector<20x256xf32>
    %57 = vector.broadcast %6 : vector<20x1xf32> to vector<20x256xf32>
    %58 = arith.subf %56, %57 : vector<20x256xf32>
    %59 = math.absf %58 : vector<20x256xf32>
    %60 = arith.addf %55, %59 : vector<20x256xf32>
    %61 = vector.broadcast %27 : vector<1x256xf32> to vector<20x256xf32>
    %62 = vector.broadcast %7 : vector<20x1xf32> to vector<20x256xf32>
    %63 = arith.subf %61, %62 : vector<20x256xf32>
    %64 = math.absf %63 : vector<20x256xf32>
    %65 = arith.addf %60, %64 : vector<20x256xf32>
    %66 = arith.mulf %21, %65 : vector<20x256xf32>
    %67 = vector.extract_strided_slice %66 {offsets = [0, 0], sizes = [20, 128], strides = [1, 1]} : vector<20x256xf32> to vector<20x128xf32>
    %68 = vector.extract_strided_slice %66 {offsets = [0, 128], sizes = [20, 128], strides = [1, 1]} : vector<20x256xf32> to vector<20x128xf32>
    %69 = arith.addf %67, %68 : vector<20x128xf32>
    %70 = arith.addf %11, %69 : vector<20x128xf32>
    %71 = vector.extract_strided_slice %21 {offsets = [0, 0], sizes = [20, 128], strides = [1, 1]} : vector<20x256xf32> to vector<20x128xf32>
    %72 = vector.extract_strided_slice %21 {offsets = [0, 128], sizes = [20, 128], strides = [1, 1]} : vector<20x256xf32> to vector<20x128xf32>
    %73 = arith.addf %71, %72 : vector<20x128xf32>
    %74 = arith.addf %10, %73 : vector<20x128xf32>
    %c0_20 = arith.constant 0 : index
    %c0_21 = arith.constant 0 : index
    %75 = vector.load %arg8[%c0_20, %c0_21] : memref<20x3xf32, #tpu.memory_space<vmem>>, vector<20x3xf32>
    %76 = arith.addf %75, %49 : vector<20x3xf32>
    %c0_22 = arith.constant 0 : index
    %c0_23 = arith.constant 0 : index
    %77 = vector.load %arg8[%c0_22, %c0_23] : memref<20x3xf32, #tpu.memory_space<vmem>>, vector<20x3xf32>
    tpu.vector_store %arg8[%c0_22, %c0_23], %76 {strides = array<i32>} : memref<20x3xf32, #tpu.memory_space<vmem>>, vector<20x3xf32>,
    %c0_24 = arith.constant 0 : index
    %c0_25 = arith.constant 0 : index
    %78 = vector.load %arg9[%c0_24, %c0_25] : memref<20x3xf32, #tpu.memory_space<vmem>>, vector<20x3xf32>
    %79 = arith.addf %78, %51 : vector<20x3xf32>
    %c0_26 = arith.constant 0 : index
    %c0_27 = arith.constant 0 : index
    %80 = vector.load %arg9[%c0_26, %c0_27] : memref<20x3xf32, #tpu.memory_space<vmem>>, vector<20x3xf32>
    tpu.vector_store %arg9[%c0_26, %c0_27], %79 {strides = array<i32>} : memref<20x3xf32, #tpu.memory_space<vmem>>, vector<20x3xf32>,
    %c0_28 = arith.constant 0 : index
    %c0_29 = arith.constant 0 : index
    %81 = vector.load %arg10[%c0_28, %c0_29] : memref<20x128xf32, #tpu.memory_space<vmem>>, vector<20x128xf32>
    %82 = arith.addf %81, %74 : vector<20x128xf32>
    %c0_30 = arith.constant 0 : index
    %c0_31 = arith.constant 0 : index
    %83 = vector.load %arg10[%c0_30, %c0_31] : memref<20x128xf32, #tpu.memory_space<vmem>>, vector<20x128xf32>
    tpu.vector_store %arg10[%c0_30, %c0_31], %82 {strides = array<i32>} : memref<20x128xf32, #tpu.memory_space<vmem>>, vector<20x128xf32>,
    %c0_32 = arith.constant 0 : index
    %c0_33 = arith.constant 0 : index
    %84 = vector.load %arg11[%c0_32, %c0_33] : memref<20x128xf32, #tpu.memory_space<vmem>>, vector<20x128xf32>
    %85 = arith.addf %84, %70 : vector<20x128xf32>
    %c0_34 = arith.constant 0 : index
    %c0_35 = arith.constant 0 : index
    %86 = vector.load %arg11[%c0_34, %c0_35] : memref<20x128xf32, #tpu.memory_space<vmem>>, vector<20x128xf32>
    tpu.vector_store %arg11[%c0_34, %c0_35], %85 {strides = array<i32>} : memref<20x128xf32, #tpu.memory_space<vmem>>, vector<20x128xf32>,
    %c0_i32_36 = arith.constant 0 : i32
    %87 = arith.cmpi eq, %arg1, %c0_i32_36 : i32
    %88 = arith.extui %87 : i1 to i32
    %c0_i32_37 = arith.constant 0 : i32
    %89 = arith.cmpi ne, %88, %c0_i32_37 : i32
    scf.if %89 {
      %c0_38 = arith.constant 0 : index
      %c0_39 = arith.constant 0 : index
      %90 = vector.load %arg10[%c0_38, %c0_39] : memref<20x128xf32, #tpu.memory_space<vmem>>, vector<20x128xf32>
      %cst_40 = arith.constant dense<0.000000e+00> : vector<20xf32>
      %91 = vector.multi_reduction <add>, %90, %cst_40 [1] : vector<20x128xf32> to vector<20xf32>
      %92 = vector.shape_cast %91 : vector<20xf32> to vector<20x1xf32>
      %c0_41 = arith.constant 0 : index
      %c0_42 = arith.constant 0 : index
      %93 = vector.load %arg11[%c0_41, %c0_42] : memref<20x128xf32, #tpu.memory_space<vmem>>, vector<20x128xf32>
      %cst_43 = arith.constant dense<0.000000e+00> : vector<20xf32>
      %94 = vector.multi_reduction <add>, %93, %cst_43 [1] : vector<20x128xf32> to vector<20xf32>
      %95 = vector.shape_cast %94 : vector<20xf32> to vector<20x1xf32>
      %c0_44 = arith.constant 0 : index
      %c0_45 = arith.constant 0 : index
      %96 = vector.load %arg8[%c0_44, %c0_45] : memref<20x3xf32, #tpu.memory_space<vmem>>, vector<20x3xf32>
      %97 = arith.mulf %96, %4 : vector<20x3xf32>
      %cst_46 = arith.constant dense<0.000000e+00> : vector<20xf32>
      %98 = vector.multi_reduction <add>, %97, %cst_46 [1] : vector<20x3xf32> to vector<20xf32>
      %99 = vector.shape_cast %98 : vector<20xf32> to vector<20x1xf32>
      %c0_47 = arith.constant 0 : index
      %c0_48 = arith.constant 0 : index
      %100 = vector.load %arg9[%c0_47, %c0_48] : memref<20x3xf32, #tpu.memory_space<vmem>>, vector<20x3xf32>
      %101 = arith.mulf %100, %4 : vector<20x3xf32>
      %cst_49 = arith.constant dense<0.000000e+00> : vector<20xf32>
      %102 = vector.multi_reduction <add>, %101, %cst_49 [1] : vector<20x3xf32> to vector<20xf32>
      %103 = vector.shape_cast %102 : vector<20xf32> to vector<20x1xf32>
      %cst_50 = arith.constant 0.000000e+00 : f32
      %104 = vector.broadcast %cst_50 : f32 to vector<20x1xf32>
      %105 = arith.cmpf ogt, %92, %104 : vector<20x1xf32>
      %cst_51 = arith.constant 1.000000e+00 : f32
      %106 = vector.broadcast %cst_51 : f32 to vector<20x1xf32>
      %107 = arith.maximumf %92, %106 : vector<20x1xf32>
      %108 = tpu.reciprocal %107 : vector<20x1xf32> -> vector<20x1xf32>
      %109 = arith.mulf %5, %5 : vector<20x1xf32>
      %110 = arith.mulf %6, %6 : vector<20x1xf32>
      %111 = arith.addf %109, %110 : vector<20x1xf32>
      %112 = arith.mulf %7, %7 : vector<20x1xf32>
      %113 = arith.addf %111, %112 : vector<20x1xf32>
      %cst_52 = arith.constant 1.000000e-16 : f32
      %114 = vector.broadcast %cst_52 : f32 to vector<20x1xf32>
      %115 = arith.maximumf %113, %114 : vector<20x1xf32>
      %116 = math.rsqrt %115 : vector<20x1xf32>
      %117 = arith.mulf %95, %108 : vector<20x1xf32>
      %cst_53 = arith.constant 0.000000e+00 : f32
      %118 = vector.broadcast %cst_53 : f32 to vector<20x1xf32>
      %119 = arith.select %105, %117, %118 : vector<20x1xi1>, vector<20x1xf32>
      %120 = arith.mulf %99, %108 : vector<20x1xf32>
      %121 = arith.mulf %120, %116 : vector<20x1xf32>
      %122 = arith.mulf %103, %108 : vector<20x1xf32>
      %123 = arith.mulf %122, %116 : vector<20x1xf32>
      %124 = arith.cmpf ogt, %121, %123 : vector<20x1xf32>
      %125 = arith.andi %105, %124 : vector<20x1xi1>
      %126 = arith.subf %121, %123 : vector<20x1xf32>
      %cst_54 = arith.constant 0.000000e+00 : f32
      %127 = vector.broadcast %cst_54 : f32 to vector<20x1xf32>
      %128 = arith.select %125, %126, %127 : vector<20x1xi1>, vector<20x1xf32>
      %129 = arith.extui %105 : vector<20x1xi1> to vector<20x1xi32>
      %130 = arith.sitofp %129 : vector<20x1xi32> to vector<20x1xf32>
      %cst_55 = arith.constant dense<0.000000e+00> : vector<1xf32>
      %131 = vector.multi_reduction <add>, %130, %cst_55 [0] : vector<20x1xf32> to vector<1xf32>
      %132 = vector.shape_cast %131 : vector<1xf32> to vector<1x1xf32>
      %cst_56 = arith.constant 1.000000e+00 : f32
      %133 = vector.broadcast %cst_56 : f32 to vector<1x1xf32>
      %134 = arith.maximumf %132, %133 : vector<1x1xf32>
      %135 = tpu.reciprocal %134 : vector<1x1xf32> -> vector<1x1xf32>
      %cst_57 = arith.constant 0.000000e+00 : f32
      %136 = vector.broadcast %cst_57 : f32 to vector<1x1xf32>
      %137 = arith.cmpf ogt, %132, %136 : vector<1x1xf32>
      %cst_58 = arith.constant dense<0.000000e+00> : vector<1xf32>
      %138 = vector.multi_reduction <add>, %119, %cst_58 [0] : vector<20x1xf32> to vector<1xf32>
      %139 = vector.shape_cast %138 : vector<1xf32> to vector<1x1xf32>
      %140 = arith.mulf %139, %135 : vector<1x1xf32>
      %cst_59 = arith.constant 0.000000e+00 : f32
      %141 = vector.broadcast %cst_59 : f32 to vector<1x1xf32>
      %142 = arith.select %137, %140, %141 : vector<1x1xi1>, vector<1x1xf32>
      %cst_60 = arith.constant 0.000000e+00 : f32
      %143 = vector.broadcast %cst_60 : f32 to vector<1x1xf32>
      %144 = arith.cmpf ogt, %132, %143 : vector<1x1xf32>
      %cst_61 = arith.constant dense<0.000000e+00> : vector<1xf32>
      %145 = vector.multi_reduction <add>, %128, %cst_61 [0] : vector<20x1xf32> to vector<1xf32>
      %146 = vector.shape_cast %145 : vector<1xf32> to vector<1x1xf32>
      %147 = arith.mulf %146, %135 : vector<1x1xf32>
      %cst_62 = arith.constant 0.000000e+00 : f32
      %148 = vector.broadcast %cst_62 : f32 to vector<1x1xf32>
      %149 = arith.select %144, %147, %148 : vector<1x1xi1>, vector<1x1xf32>
      %150 = vector.shape_cast %142 : vector<1x1xf32> to vector<1x1x1xf32>
      %151 = vector.shape_cast %150 : vector<1x1x1xf32> to vector<1x1x1xf32>
      %152 = vector.broadcast %151 : vector<1x1x1xf32> to vector<1x1x128xf32>
      %c0_63 = arith.constant 0 : index
      %c0_64 = arith.constant 0 : index
      %c0_65 = arith.constant 0 : index
      %153 = vector.load %arg6[%c0_63, %c0_64, %c0_65] : memref<1x1x128xf32, #tpu.memory_space<vmem>>, vector<1x1x128xf32>
      tpu.vector_store %arg6[%c0_63, %c0_64, %c0_65], %152 {strides = array<i32>} : memref<1x1x128xf32, #tpu.memory_space<vmem>>, vector<1x1x128xf32>,
      %154 = vector.shape_cast %149 : vector<1x1xf32> to vector<1x1x1xf32>
      %155 = vector.shape_cast %154 : vector<1x1x1xf32> to vector<1x1x1xf32>
      %156 = vector.broadcast %155 : vector<1x1x1xf32> to vector<1x1x128xf32>
      %c0_66 = arith.constant 0 : index
      %c0_67 = arith.constant 0 : index
      %c0_68 = arith.constant 0 : index
      %157 = vector.load %arg7[%c0_66, %c0_67, %c0_68] : memref<1x1x128xf32, #tpu.memory_space<vmem>>, vector<1x1x128xf32>
      tpu.vector_store %arg7[%c0_66, %c0_67, %c0_68], %156 {strides = array<i32>} : memref<1x1x128xf32, #tpu.memory_space<vmem>>, vector<1x1x128xf32>,
    } else {
    }
    return
  }
  func.func @transform_0(%arg0: i32, %arg1: i32) -> (i32, i32, i32) {
    %c0_i32 = arith.constant 0 : i32
    %c0_i32_0 = arith.constant 0 : i32
    return %arg0, %c0_i32, %arg1 : i32, i32, i32
  }
  func.func @transform_1(%arg0: i32, %arg1: i32) -> (i32, i32, i32) {
    %c0_i32 = arith.constant 0 : i32
    %c0_i32_0 = arith.constant 0 : i32
    return %arg0, %c0_i32, %arg1 : i32, i32, i32
  }
  func.func @transform_2(%arg0: i32, %arg1: i32) -> (i32, i32, i32) {
    %c0_i32 = arith.constant 0 : i32
    %c0_i32_0 = arith.constant 0 : i32
    %c0_i32_1 = arith.constant 0 : i32
    return %arg0, %c0_i32, %c0_i32_0 : i32, i32, i32
  }
  func.func @transform_3(%arg0: i32, %arg1: i32) -> (i32, i32, i32) {
    %c0_i32 = arith.constant 0 : i32
    %c0_i32_0 = arith.constant 0 : i32
    return %arg0, %c0_i32, %arg1 : i32, i32, i32
  }
  func.func @transform_4(%arg0: i32, %arg1: i32) -> (i32, i32, i32) {
    %c0_i32 = arith.constant 0 : i32
    %c0_i32_0 = arith.constant 0 : i32
    %c0_i32_1 = arith.constant 0 : i32
    return %arg0, %c0_i32, %c0_i32_0 : i32, i32, i32
  }
  func.func @transform_5(%arg0: i32, %arg1: i32) -> (i32, i32, i32) {
    %c0_i32 = arith.constant 0 : i32
    %c0_i32_0 = arith.constant 0 : i32
    %c0_i32_1 = arith.constant 0 : i32
    return %arg0, %c0_i32, %c0_i32_0 : i32, i32, i32
  }
}

</mosaic_0001>

<bundles_post_ra>
// kernel: tpu_custom_call.1
= control target key start
LH: loop header
LB: loop body
LE: loop exit
PB: predicated region body
PF: predicated region fallthrough
CT: control target
= control target key end

     0   :  { %11 = vsyncpa [#allocation7], 0  ;;  %s3116_s0 = inlined_call_operand.vmem [shape: f32[2,3,256], index: 0, kind: input, shape index: {}]   ;;  %s3117_s1 = inlined_call_operand.vmem [shape: f32[2,3,256], index: 1, kind: input, shape index: {}]   ;;  %s3118_s2 = inlined_call_operand.vmem [shape: f32[2,20,3], index: 2, kind: input, shape index: {}]   ;;  %s3119_s3 = inlined_call_operand.vmem [shape: f32[2,20,256], index: 3, kind: input, shape index: {}]   ;;  %s3120_s4 = inlined_call_operand.hbm [shape: f32[2,1,128], index: 4, kind: output, shape index: {0}]   ;;  %s3121_s5 = inlined_call_operand.hbm [shape: f32[2,1,128], index: 5, kind: output, shape index: {1}]  }
   0x1   :  { %13 = vsyncpa [#allocation7 + $0x1], 0 }
   0x2   :  { %14 = vsyncpa [#allocation9], 0 }
   0x3   :  { %16 = vsyncpa [#allocation9 + $0x1], 0  ;;  %s2509_s18 = smov 0   ;;  %s2511_s19 = smov 0  }
   0x4   :  { %s2513_s20 = smov 0   ;;  %s2515_s21 = smov 0  }
   0x5   :  { %s2517_s22 = smov 0   ;;  %s2519_s23 = smov 0  }
   0x6 LB: > { %s2198_s24 = sadd.s32 4294967295, %s2468_s23   ;;  %s2199_s25 = sadd.s32 4294967294, %s2468_s23   ;;  %s2468_s23 = sphi %s2519_s23, %s22_s23   ;;  %s2464_s22 = sphi %s2517_s22, %s3128_s22   ;;  %s2460_s21 = sphi %s2515_s21, %s3127_s21   ;;  %s2456_s20 = sphi %s2513_s20, %s3126_s20   ;;  %s2452_s19 = sphi %s2511_s19, %s3125_s19   ;;  %s2448_s18 = sphi %s2509_s18, %s3124_s18  }
   0x7   : > { %s34_s26 = sadd.s32 1, %s2464_s22  ;;  %s151_s27 = sadd.s32 1, %s2456_s20 }
   0x8   : > { %p36_p0 = scmp.ge.s32.totalorder %s34_s26, 2  ;;  %p161_p1 = scmp.ne.s32.totalorder %s2456_s20, %s2452_s19 }
   0x9   : > { %p162_p2 = scmp.eq.s32.totalorder %s2198_s24, 1  ;;  %p167_p3 = scmp.ne.s32.totalorder %s2452_s19, %s2448_s18 }
   0xa   : > { %s3130_s26 = smov (%p36_p0, %s34_s26), 0  ;;  %p168_p5 = scmp.eq.s32.totalorder %s2199_s25, 1 }
   0xb   : > { %p2549_p4 = por %p162_p2, %p161_p1  ;;  %s148_s29 = ssub.s32 %s2464_s22, %s3130_s26 }
   0xc   : > { %p2202_p6 = scmp.ge.s32.totalorder %s2468_s23, 1  ;;  %p149_p7 = scmp.eq.s32.totalorder %s148_s29, 0 }
   0xd   : > { %p2556_p8 = por %p168_p5, %p167_p3  ;;  %p259_p9 = scmp.lt.s32.totalorder %s2468_s23, 3 }
   0xe   : > { %s2562_s6 = scalar_select %p149_p7, %s2456_s20, %s151_s27  }
   0xf   : > { %p260_p10 = pnand %p2202_p6, %p259_p9 }
  0x10   : > { %p318_p11 = scmp.lt.s32.totalorder (!%p260_p10), %s2460_s21, 1  ;;  %v2470_v0 = vmov (!%p260_p10), 0.0   ;;  %v2471_v1 = vmov (!%p260_p10), 1   ;;  %v2472_v2 = vmov (!%p260_p10), 0   ;;  %v2473_v13 = vmov (!%p260_p10), 1.0   ;;  %s3033_s10 = sand.u32 (!%p260_p10), 1, %s2452_s19  }
  0x11   : > { %263 = sbr.rel (%p260_p10) target bundleno = 695 (0x2b7), region = 36  ;;  %366 = vst [vmem:[#allocation4 + $0x10] sm:$0xf] (!%p260_p10), %v2470_v0  ;;  %369 = vst [vmem:[#allocation5 + $0x10] sm:$0xf] (!%p260_p10), %v2470_v0  ;;  %2334 = vset.pattern.permute.xlu1 (!%p260_p10), %v2471_v1  ;;  %2333 = vset.pattern.permute.xlu0 (!%p260_p10), %v2472_v2  ;;  %v424_v31 = vlaneseq (!%p260_p10)  ;;  %v2474_v39 = vmov (!%p260_p10), 2  }
  0x12   : > { %vm1853_vm6 = vcmask (!%p260_p10), 1043456   ;;  %vm356_vm7 = vcmask (!%p260_p10), 23552   ;;  %vm359_vm8 = vcmask (!%p260_p10), 19456   ;;  %s310_s11 = scalar_lea.vmem (!%p260_p10), [#allocation6], %s3033_s10  ;;  %s2024_s17 = scalar_lea.sflag (!%p260_p10), [#allocation7], %s3033_s10 }
  0x13   : > { %v2672_v40 = vshrl.u32 (!%p260_p10), %v424_v31, 7  ;;  %357 = vst.msk [vmem:[#allocation2] sm:$0xff] (!%p260_p10), %vm356_vm7, %v2470_v0  ;;  %358 = vst.msk [vmem:[#allocation2 + $0x8] sm:$0xff] (!%p260_p10), %vm356_vm7, %v2470_v0 }
  0x14   : > { %361 = vst.msk [vmem:[#allocation3] sm:$0xff] (!%p260_p10), %vm356_vm7, %v2470_v0  ;;  %362 = vst.msk [vmem:[#allocation3 + $0x8] sm:$0xff] (!%p260_p10), %vm356_vm7, %v2470_v0 }
  0x15   : > { %v2677_v44 = vsub.s32 (!%p260_p10), 0, %v2672_v40  ;;  %v2680_v45 = vsub.s32 (!%p260_p10), 4, %v2672_v40  ;;  %360 = vst.msk [vmem:[#allocation2 + $0x10] sm:$0xf] (!%p260_p10), %vm359_vm8, %v2470_v0  ;;  %363 = vst.msk [vmem:[#allocation3 + $0x10] sm:$0xf] (!%p260_p10), %vm359_vm8, %v2470_v0 }
  0x18   : > { %s319_s7 = scalar_select %p318_p11, %s2460_s21, 1  ;;  %v1827_v35 = vld [vmem:[#allocation4 + $0x10] sm:$0xf] }
  0x1a   : > { %s2262_s8 = sshll.u32 %s319_s7, 3  ;;  %s2265_s9 = smul.u32 48, %s319_s7 }
  0x1b   : > { %s325_s12 = scalar_lea.vmem %s3116_s0, %s2262_s8  ;;  %s2264_s16 = smul.u32 24, %s319_s7 }
  0x1c   : > { %s350_s15 = scalar_lea.vmem %s3119_s3, %s2265_s9  ;;  %v2575_v3 = vld [vmem:[%s325_s12] sm:$0x77]  ;;  %s335_s25 = scalar_lea.vmem %s3117_s1, %s2262_s8 }
  0x1d   : > { %v399_v4 = vmul.f32 %v2575_v3, %v2575_v3  ;;  %v2582_v5 = vld [vmem:[%s350_s15] sm:$0xff]  ;;  %v2584_v6 = vld [vmem:[%s350_s15 + $0x8] sm:$0xff]  ;;  %v2586_v7 = vld [vmem:[%s350_s15 + $0x18] sm:$0xff]  ;;  %s341_s7 = scalar_lea.vmem %s3118_s2, %s2264_s16  ;;  %s2475_s8 = smov 127  }
  0x1e   : > { %vm381_vm0 = vcmp.gt.f32.partialorder %v2582_v5, 0.0  ;;  %vm382_vm1 = vcmp.gt.f32.partialorder %v2584_v6, 0.0  ;;  %vm384_vm2 = vcmp.gt.f32.partialorder %v2586_v7, 0.0  ;;  %v2591_v8 = vld [vmem:[%s350_s15 + $0x10] sm:$0xff]  ;;  %v2609_v14 = vld [vmem:[%s335_s25] sm:$0x77] }
  0x1f   : > { %v2215_v9 = vrot.slane %v399_v4, 9  ;;  %v2216_v10 = vrot.slane %v399_v4, 10  ;;  %v2599_v11 = vsel %vm381_vm0, 1.0, %v2470_v0  ;;  %v2604_v12 = vsel %vm382_vm1, 1.0, %v2470_v0  ;;  %2219 = vmatprep.mubr.msk.f32.mxu1 %vm382_vm1, %v2473_v13  ;;  %v2619_v17 = vld [vmem:[%s341_s7] sm:$0xff]  ;;  %v2643_v25 = vld [vmem:[%s341_s7 + $0x8] sm:$0xff] }
  0x20   : > { %v2613_v15 = vsub.f32 %v2604_v12, %v2604_v12  ;;  %v2617_v16 = vadd.f32 %v2604_v12, %v2599_v11  ;;  %vm383_vm3 = vcmp.gt.f32.partialorder %v2591_v8, 0.0  ;;  %v2622_v19 = vld [vmem:[%s350_s15 + $0x28] sm:$0xf]  ;;  %v2624_v20 = vld [vmem:[%s350_s15 + $0x20] sm:$0xf]  ;;  %1710 = vperm.xlu1 %2334, %v2619_v17   ;;  %1666 = vperm.xlu0 %2333, %v2619_v17   ;;  %v2634_v22 = vsel %vm384_vm2, 1.0, %v2470_v0 }
  0x21   : > { %v404_v18 = vadd.f32 %v2215_v9, %v399_v4  ;;  %v2639_v23 = vsel %vm383_vm3, 1.0, %v2470_v0  ;;  %v2641_v24 = vld [vmem:[%s341_s7 + $0x10] sm:$0xf]  ;;  %v411_v28 = vmul.f32 %v2609_v14, %v2609_v14  ;;  %vm386_vm4 = vcmp.gt.f32.partialorder %v2622_v19, 0.0  ;;  %s2476_s9 = smov 126   ;;  %s2258_s12 = sshll.u32 %s2460_s21, 4 }
  0x22   : > { %v2629_v21 = vand.u32 4294901760, %v2613_v15  ;;  %v2647_v27 = vadd.f32 %v2634_v22, %v2639_v23  ;;  %vm385_vm5 = vcmp.gt.f32.partialorder %v2624_v20, 0.0  ;;  %v2662_v33 = vsel %vm386_vm4, 1.0, %v2470_v0  ;;  %s3042_s15 = scalar_lea.hbm %s3120_s4, %s2258_s12  ;;  %s2040_s16 = sshll.u32 %s310_s11, 4  ;;  %s2041_s16 = int_to_ptr.vmem [resolvable:$true] %s2040_s16 }
  0x23   : > { %v408_v26 = vadd.f32 %v2216_v10, %v404_v18  ;;  %v2667_v34 = vsel %vm385_vm5, 1.0, %v2470_v0  ;;  %v2217_v37 = vrot.slane %v411_v28, 9  ;;  %v2218_v38 = vrot.slane %v411_v28, 10  ;;  %s2358_s24 = scalar_lea.vmem %s2041_s16, 16  ;;  %s2477_s25 = smov [#allocation6]  }
  0x24   : > { %v543_v29 = vsub.f32 %v2613_v15, %v2629_v21  ;;  %1718 = vperm.xlu1 %2334, %v2641_v24   ;;  %1671 = vperm.xlu0 %2333, %v2643_v25   ;;  %v1801_v36 = vadd.f32 %v2662_v33, %v2667_v34  ;;  %v2686_v48 = vsub.f32 %v2599_v11, %v2599_v11  ;;  %v1693_v7 = vsub.s32 1, %v2672_v40  ;;  %p2359_p12 = scmp.ne.s32.totalorder %s2041_s16, %s2358_s24  ;;  %s2362_s27 = sshll.u32 %s2477_s25, 4  ;;  %s2363_s27 = int_to_ptr.vmem [resolvable:$false] %s2362_s27 }
  0x25   : > { %v409_v30 = vmax.f32 %v408_v26, 1e-16  ;;  %v416_v42 = vadd.f32 %v2217_v37, %v411_v28  ;;  %v2693_v51 = vsub.f32 %v2634_v22, %v2634_v22  ;;  %v2703_v56 = vsub.f32 %v2639_v23, %v2639_v23  ;;  %s2364_s29 = scalar_lea.vmem %s2363_s27, 32  ;;  %p2365_p1 = scmp.lt.s32.totalorder %s2041_s16, %s2363_s27 }
  0x26   : > { %v2657_v32 = vand.u32 4294901760, %v543_v29  ;;  %v1830_v41 = vadd.f32 %v1827_v35, %v1801_v36  ;;  %v2699_v54 = vand.u32 4294901760, %v2686_v48  ;;  %v2710_v58 = vsub.f32 %v2662_v33, %v2662_v33  ;;  %p2360_p13 = pnand %p2359_p12, %p2549_p4  ;;  %p2366_p2 = scmp.lt.s32.totalorder %s2364_s29, %s2358_s24 }
  0x27   : > { %2340 = vrsqrt.f32 %v409_v30  ;;  %v420_v43 = vadd.f32 %v2218_v38, %v416_v42  ;;  %v2706_v57 = vand.u32 4294901760, %v2693_v51  ;;  %v2921_v5 = vmul.f32 %v2641_v24, %v2641_v24 }
  0x28   : > { %545 = vmatprep.mubr.f32.mxu0 %v2657_v32  ;;  %2336 = vset.pattern.permute.xlu1 %v2474_v39  ;;  %1833 = vst [vmem:[#allocation4 + $0x10] sm:$0xf] %v1830_v41  ;;  %v549_v60 = vsub.f32 %v2686_v48, %v2699_v54  ;;  %v2727_v9 = vand.u32 4294901760, %v2710_v58  ;;  %v2927_v6 = vmul.f32 %v2643_v25, %v2643_v25  ;;  %v1697_v8 = vsub.s32 5, %v2672_v40  ;;  %p2361_p0 = pneg %p2360_p13  ;;  %p2367_p3 = por %p2366_p2, %p2365_p1 }
  0x29   : > { %2335 = vset.pattern.permute.xlu0 %v2471_v1  ;;  %1758 = vperm.xlu1 %2336, %v2619_v17   ;;  %v421_v46 = vmax.f32 %v420_v43, 1e-16  ;;  %v2718_v1 = vand.u32 4294901760, %v2703_v56  ;;  %v558_v4 = vsub.f32 %v2693_v51, %v2706_v57 }
  0x2a   : > { %1714 = vperm.xlu0 %2335, %v2643_v25   ;;  %v2732_v28 = vand.u32 4294901760, %v549_v60  ;;  %v1698_v19 = vrot.slane %v2609_v14, %v1697_v8  ;;  %p2368_p5 = pnand %p2367_p3, %p2361_p0 }
  0x2b   : > { %2342 = vrsqrt.f32 %v421_v46  ;;  %v564_v31 = vsub.f32 %v2703_v56, %v2718_v1  ;;  %v2742_v38 = vand.u32 4294901760, %v558_v4 }
  0x2d   : > { %1766 = vperm.xlu1 %2336, %v2641_v24  }
  0x2e   : > { %2337 = vset.pattern.permute.xlu0 %v2474_v39  ;;  %v573_v39 = vsub.f32 %v2710_v58, %v2727_v9 }
  0x2f   : > { %1762 = vperm.xlu0 %2337, %v2643_v25  }
  0x31   : > { %v2341_v47 = vpop.eup %2340  ;;  %2338 = vset.pattern.permute.xlu1 %v2472_v2 }
  0x32   : > { %v427_v49 = vrot.slane %v2341_v47, %v2677_v44  ;;  %v431_v50 = vrot.slane %v2341_v47, %v2680_v45  ;;  %v2748_v47 = vand.u32 4294901760, %v564_v31  ;;  %v2832_v31 = vmul.f32 %v2619_v17, %v2619_v17 }
  0x33   : > { %2339 = vset.pattern.permute.xlu0 %v2472_v2  ;;  %v2722_v2 = vsub.f32 %v2667_v34, %v2667_v34 }
  0x34   : > { %v437_v52 = vrot.slane %v427_v49, %v2677_v44  ;;  %v441_v53 = vrot.slane %v431_v50, %v2677_v44 }
  0x35   : > { %v2343_v61 = vpop.eup %2342  ;;  %v2739_v37 = vand.u32 4294901760, %v2722_v2 }
  0x36   : > { %v444_v55 = vcombine.low %v437_v52, %v441_v53  ;;  %v455_v10 = vrot.slane %v2343_v61, %v2680_v45  ;;  %v2753_v53 = vand.u32 4294901760, %v573_v39 }
  0x37   : > { %v579_v50 = vsub.f32 %v2722_v2, %v2739_v37 }
  0x38   : > { %v446_v59 = vmul.f32 %v444_v55, %v2575_v3  ;;  %v451_v3 = vrot.slane %v2343_v61, %v2677_v44  ;;  %v465_v30 = vrot.slane %v455_v10, %v2677_v44 }
  0x39   : > { %v2758_v61 = vand.u32 4294901760, %v579_v50 }
  0x3a   : > { %v472_v62 = vcombine.high %v446_v59, %v446_v59  ;;  %v2715_v63 = vand.u32 4294901760, %v446_v59  ;;  %v461_v29 = vrot.slane %v451_v3, %v2677_v44  ;;  %v1848_v3 = vld [vmem:[#allocation4 + $0x10] sm:$0xf] }
  0x3c   : > { %v474_v18 = vand.u32 4294901760, %v472_v62  ;;  %v593_v26 = vsub.f32 %v446_v59, %v2715_v63  ;;  %v468_v41 = vcombine.low %v461_v29, %v465_v30 }
  0x3e   : > { %475 = vmatprep.subr.mxu0 %v474_v18  ;;  %v587_v35 = vsub.f32 %v472_v62, %v474_v18  ;;  %v594_v36 = vand.u32 4294901760, %v593_v26  ;;  %v470_v46 = vmul.f32 %v468_v41, %v2609_v14 }
  0x3f   : > { %477 = vmatpush1.xpose.msra.mxu0 %v2715_v63 }
  0x40   : > { %v588_v42 = vand.u32 4294901760, %v587_v35  ;;  %v595_v43 = vsub.f32 %v593_v26, %v594_v36  ;;  %684 = vmatprep.subr.mxu0 %v587_v35  ;;  %v1059_v55 = vcombine.high %v470_v46, %v470_v46  ;;  %v2779_v10 = vand.u32 4294901760, %v470_v46 }
  0x42   : > { %551 = vmatmul.mubr.f32.vlgmr.msra.gmra.mrb[0].mxu0 %v2732_v28  ;;  %v589_v49 = vsub.f32 %v587_v35, %v588_v42  ;;  %v596_v52 = vand.u32 4294901760, %v595_v43  ;;  %v2755_v60 = vand.u32 4294901760, %v1059_v55  ;;  %v1180_v29 = vsub.f32 %v470_v46, %v2779_v10 }
  0x43   : > { %560 = vmatprep.mubr.f32.mxu0 %v2742_v38  ;;  %687 = vmatpush1.xpose.msra.mxu0 %v593_v26 }
  0x44   : > { %v590_v59 = vand.u32 4294901760, %v589_v49  ;;  %881 = vmatprep.subr.mxu0 %v588_v42  ;;  %v1174_v62 = vsub.f32 %v1059_v55, %v2755_v60 }
  0x46   : > { %566 = vmatmul.mubr.f32.gmra.mrb[2].mxu0 %v2748_v47  ;;  %591 = vmatprep.subr.mxu1 %v590_v59  ;;  %v1175_v4 = vand.u32 4294901760, %v1174_v62 }
  0x47   : > { %597 = vmatpush1.xpose.msra.mxu1 %v596_v52  ;;  %575 = vmatprep.mubr.f32.mxu0 %v2753_v53 }
  0x48   : > { %779 = vmatprep.subr.mxu1 %v474_v18  ;;  %v1176_v26 = vsub.f32 %v1174_v62, %v1175_v4 }
  0x4a   : > { %581 = vmatmul.mubr.f32.gmra.mrb[4].mxu0 %v2758_v61  ;;  %2220 = vmatmul.mubr.msk.f32.vlgmr.msra.gmra.mrb[0].mxu1 %vm381_vm0, %v2473_v13  ;;  %v1177_v30 = vand.u32 4294901760, %v1176_v26 }
  0x4b   : > { %781 = vmatpush1.xpose.msra.mxu1 %v2715_v63  ;;  %2221 = vmatprep.mubr.msk.f32.mxu1 %vm384_vm2, %v2473_v13 }
  0x4c   : > { %752 = vmatprep.mubr.f32.mxu0 %v2613_v15  ;;  %971 = vmatprep.subr.mxu1 %v474_v18  ;;  %v1854_v18 = vsel %vm1853_vm6, %v1848_v3, 0.0 }
  0x4e   : > { %2222 = vmatmul.mubr.msk.f32.gmra.mrb[2].mxu1 %vm383_vm3, %v2473_v13  ;;  %755 = vmatmul.mubr.f32.vlgmr.msra.gmra.mrb[6].mxu0 %v2686_v48 }
  0x4f   : > { %2223 = vmatprep.mubr.msk.f32.mxu1 %vm386_vm4, %v2473_v13  ;;  %761 = vmatprep.mubr.f32.mxu0 %v2693_v51 }
  0x50   : > { %885 = vmatpush1.xpose.msra.mxu0 %v594_v36  ;;  %1851 = vadd.xlane.f32.xlu0 %v2647_v27  ;;  %v1181_v27 = vand.u32 4294901760, %v1180_v29 }
  0x51   : > { %1062 = vmatprep.subr.mxu0 %v2755_v60  ;;  %1849 = vadd.xlane.f32.xlu1 %v2617_v16 }
  0x52   : > { %2224 = vmatmul.mubr.msk.f32.gmra.mrb[4].mxu1 %vm385_vm5, %v2473_v13  ;;  %764 = vmatmul.mubr.f32.gmra.mrb[8].mxu0 %v2703_v56  ;;  %v1182_v16 = vsub.f32 %v1180_v29, %v1181_v27 }
  0x53   : > { %770 = vmatprep.mubr.f32.mxu0 %v2710_v58  ;;  %847 = vmatprep.mubr.f32.mxu1 %v2629_v21 }
  0x54   : > { %1855 = vadd.xlane.f32.xlu0 %v1854_v18 }
  0x56   : > { %773 = vmatmul.mubr.f32.gmra.mrb[10].mxu0 %v2722_v2  ;;  %851 = vmatmul.mubr.f32.vlgmr.msra.gmra.mrb[6].mxu1 %v2699_v54 }
  0x57   : > { %973 = vmatpush1.xpose.msra.mxu1 %v2715_v63  ;;  %858 = vmatprep.mubr.f32.mxu1 %v2706_v57  ;;  %v1183_v63 = vand.u32 4294901760, %v1182_v16 }
  0x58   : > { %2225 = vmatprep.mubr.msk.f32.mxu0 %vm382_vm1, %v2473_v13  ;;  %1178 = vmatprep.subr.mxu1 %v1177_v30 }
  0x5a   : > { %862 = vmatmul.mubr.f32.gmra.mrb[8].mxu1 %v2718_v1  ;;  %2226 = vmatmul.mubr.msk.f32.vlgmr.msra.gmra.mrb[12].mxu0 %vm381_vm0, %v2473_v13 }
  0x5b   : > { %869 = vmatprep.mubr.f32.mxu1 %v2727_v9  ;;  %2227 = vmatprep.mubr.msk.f32.mxu0 %vm384_vm2, %v2473_v13 }
  0x5c   : > { %1064 = vmatpush1.xpose.msra.mxu0 %v2779_v10 }
  0x5d   : > { %1271 = vmatprep.subr.mxu0 %v1174_v62 }
  0x5e   : > { %873 = vmatmul.mubr.f32.gmra.mrb[10].mxu1 %v2739_v37  ;;  %2228 = vmatmul.mubr.msk.f32.gmra.mrb[14].mxu0 %vm383_vm3, %v2473_v13 }
  0x5f   : > { %2229 = vmatprep.mubr.msk.f32.mxu0 %vm386_vm4, %v2473_v13  ;;  %2231 = vmatprep.mubr.msk.f32.mxu1 %vm382_vm1, %v2473_v13 }
  0x62   : > { %2230 = vmatmul.mubr.msk.f32.gmra.mrb[16].mxu0 %vm385_vm5, %v2473_v13  ;;  %2232 = vmatmul.mubr.msk.f32.vlgmr.msra.gmra.mrb[12].mxu1 %vm381_vm0, %v2473_v13 }
  0x63   : > { %1184 = vmatpush1.xpose.msra.mxu1 %v1183_v63  ;;  %2233 = vmatprep.mubr.msk.f32.mxu1 %vm384_vm2, %v2473_v13 }
  0x64   : > { %1132 = vmatprep.mubr.f32.mxu0 %v2657_v32  ;;  %1366 = vmatprep.subr.mxu1 %v2755_v60 }
  0x65   : > { %1676 = vperm.xlu1 %2338, %v2641_v24  }
  0x66   : > { %2234 = vmatmul.mubr.msk.f32.gmra.mrb[14].mxu1 %vm383_vm3, %v2473_v13  ;;  %1138 = vmatmul.mubr.f32.vlgmr.msra.gmra.mrb[18].mxu0 %v2732_v28 }
  0x67   : > { %2235 = vmatprep.mubr.msk.f32.mxu1 %vm386_vm4, %v2473_v13  ;;  %1147 = vmatprep.mubr.f32.mxu0 %v2742_v38 }
  0x68   : > { %1274 = vmatpush1.xpose.msra.mxu0 %v1180_v29 }
  0x69   : > { %1468 = vmatprep.subr.mxu0 %v1175_v4  ;;  %1912 = vrot.lane.b32.xlu1 %v2832_v31, %s2475_s8 }
  0x6a   : > { %2236 = vmatmul.mubr.msk.f32.gmra.mrb[16].mxu1 %vm385_vm5, %v2473_v13  ;;  %1153 = vmatmul.mubr.f32.gmra.mrb[20].mxu0 %v2748_v47 }
  0x6b   : > { %1162 = vmatprep.mubr.f32.mxu0 %v2753_v53  ;;  %2237 = vmatprep.mubr.msk.f32.mxu1 %vm382_vm1, %v2473_v13 }
  0x6c   : > { %1914 = vrot.lane.b32.xlu0 %v2927_v6, %s2475_s8 }
  0x6d   : > { %1916 = vrot.lane.b32.xlu1 %v2921_v5, %s2475_s8 }
  0x6e   : > { %1168 = vmatmul.mubr.f32.gmra.mrb[22].mxu0 %v2758_v61  ;;  %2238 = vmatmul.mubr.msk.f32.vlgmr.msra.gmra.mrb[18].mxu1 %vm381_vm0, %v2473_v13 }
  0x6f   : > { %1368 = vmatpush1.xpose.msra.mxu1 %v2779_v10  ;;  %2239 = vmatprep.mubr.msk.f32.mxu1 %vm384_vm2, %v2473_v13 }
  0x70   : > { %1339 = vmatprep.mubr.f32.mxu0 %v2613_v15  ;;  %1558 = vmatprep.subr.mxu1 %v2755_v60  ;;  %v1694_v15 = vrot.slane %v2609_v14, %v1693_v7 }
  0x71   : > { %1926 = vrot.lane.b32.xlu1 %v2927_v6, %s2476_s9  ;;  %1924 = vrot.lane.b32.xlu0 %v2832_v31, %s2476_s9 }
  0x72   : > { %2240 = vmatmul.mubr.msk.f32.gmra.mrb[20].mxu1 %vm383_vm3, %v2473_v13  ;;  %1342 = vmatmul.mubr.f32.vlgmr.msra.gmra.mrb[24].mxu0 %v2686_v48  ;;  %v1704_v20 = vrot.slane %v1694_v15, %v1693_v7 }
  0x73   : > { %2241 = vmatprep.mubr.msk.f32.mxu1 %vm386_vm4, %v2473_v13  ;;  %1348 = vmatprep.mubr.f32.mxu0 %v2693_v51 }
  0x74   : > { %1472 = vmatpush1.xpose.msra.mxu0 %v1181_v27 }
  0x76   : > { %2242 = vmatmul.mubr.msk.f32.gmra.mrb[22].mxu1 %vm385_vm5, %v2473_v13  ;;  %1351 = vmatmul.mubr.f32.gmra.mrb[26].mxu0 %v2703_v56 }
  0x77   : > { %1357 = vmatprep.mubr.f32.mxu0 %v2710_v58  ;;  %1434 = vmatprep.mubr.f32.mxu1 %v2629_v21  ;;  %v1708_v21 = vrot.slane %v1698_v19, %v1693_v7  ;;  %v1741_v58 = vsub.s32 2, %v2672_v40 }
  0x79   : > { %v1742_v35 = vrot.slane %v2609_v14, %v1741_v58 }
  0x7a   : > { %1360 = vmatmul.mubr.f32.gmra.mrb[28].mxu0 %v2722_v2  ;;  %1438 = vmatmul.mubr.f32.vlgmr.msra.gmra.mrb[24].mxu1 %v2699_v54  ;;  %v1649_v54 = vrot.slane %v2609_v14, %v2677_v44 }
  0x7b   : > { %1560 = vmatpush1.xpose.msra.mxu1 %v2779_v10  ;;  %1445 = vmatprep.mubr.f32.mxu1 %v2706_v57  ;;  %v1653_v57 = vrot.slane %v2609_v14, %v2680_v45  ;;  %v1752_v42 = vrot.slane %v1742_v35, %v1741_v58 }
  0x7c   : > { %2243 = vmatprep.mubr.msk.f32.mxu0 %vm382_vm1, %v2473_v13  ;;  %v1659_v2 = vrot.slane %v1649_v54, %v2677_v44 }
  0x7e   : > { %1449 = vmatmul.mubr.f32.gmra.mrb[26].mxu1 %v2718_v1  ;;  %2244 = vmatmul.mubr.msk.f32.vlgmr.msra.gmra.mrb[30].mxu0 %vm381_vm0, %v2473_v13  ;;  %v1745_v1 = vsub.s32 6, %v2672_v40 }
  0x7f   : > { %1456 = vmatprep.mubr.f32.mxu1 %v2727_v9  ;;  %2245 = vmatprep.mubr.msk.f32.mxu0 %vm384_vm2, %v2473_v13  ;;  %v1663_v9 = vrot.slane %v1653_v57, %v2677_v44 }
  0x80   : > { %v1746_v36 = vrot.slane %v2609_v14, %v1745_v1 }
  0x82   : > { %1460 = vmatmul.mubr.f32.gmra.mrb[28].mxu1 %v2739_v37  ;;  %2246 = vmatmul.mubr.msk.f32.gmra.mrb[32].mxu0 %vm383_vm3, %v2473_v13  ;;  %v1756_v43 = vrot.slane %v1746_v36, %v1741_v58 }
  0x83   : > { %2247 = vmatprep.mubr.msk.f32.mxu0 %vm386_vm4, %v2473_v13  ;;  %2249 = vmatprep.mubr.msk.f32.mxu1 %vm382_vm1, %v2473_v13 }
  0x86   : > { %2248 = vmatmul.mubr.msk.f32.gmra.mrb[34].mxu0 %vm385_vm5, %v2473_v13  ;;  %2250 = vmatmul.mubr.msk.f32.vlgmr.msra.gmra.mrb[30].mxu1 %vm381_vm0, %v2473_v13  ;;  %vm2001_vm0 = vcmask 7168  }
  0x87   : > { %2251 = vmatprep.mubr.msk.f32.mxu1 %vm384_vm2, %v2473_v13  ;;  %vm2005_vm2 = vcmask 3072  }
  0x8a   : > { %2252 = vmatmul.mubr.msk.f32.gmra.mrb[32].mxu1 %vm383_vm3, %v2473_v13 }
  0x8b   : > { %2253 = vmatprep.mubr.msk.f32.mxu1 %vm386_vm4, %v2473_v13 }
  0x8e   : > { %2254 = vmatmul.mubr.msk.f32.gmra.mrb[34].mxu1 %vm385_vm5, %v2473_v13 }
  0x9f   : > { %v1711_v13 = vpop.permute.xlu1 %1710  ;;  %v1667_v51 = vpop.permute.xlu0 %1666 }
  0xa0   : > { %v1721_v48 = vsub.f32 %v1704_v20, %v1711_v13  ;;  %v1722_v56 = vsub.f32 %v1708_v21, %v1711_v13  ;;  %v1679_v38 = vsub.f32 %v1659_v2, %v1667_v51  ;;  %v1680_v41 = vsub.f32 %v1663_v9, %v1667_v51 }
  0xa2   : > { %v1727_v37 = vand.u32 2147483647, %v1721_v48  ;;  %v1728_v39 = vand.u32 2147483647, %v1722_v56  ;;  %v1685_v45 = vand.u32 2147483647, %v1679_v38 }
  0xa3   : > { %v1719_v32 = vpop.permute.xlu1 %1718  ;;  %v1672_v46 = vpop.permute.xlu0 %1671  ;;  %v1686_v47 = vand.u32 2147483647, %v1680_v41 }
  0xa4   : > { %v1733_v50 = vadd.f32 %v1727_v37, %v1685_v45  ;;  %v1681_v59 = vsub.f32 %v1659_v2, %v1672_v46  ;;  %v1682_v60 = vsub.f32 %v1663_v9, %v1672_v46  ;;  %v1725_v18 = vsub.f32 %v1704_v20, %v1719_v32 }
  0xa5   : > { %v1734_v52 = vadd.f32 %v1728_v39, %v1686_v47  ;;  %v1726_v27 = vsub.f32 %v1708_v21, %v1719_v32 }
  0xa6   : > { %v1687_v29 = vand.u32 2147483647, %v1681_v59  ;;  %v1688_v30 = vand.u32 2147483647, %v1682_v60 }
  0xa7   : > { %v1732_v56 = vand.u32 2147483647, %v1726_v27 }
  0xa8   : > { %v1759_v28 = vpop.permute.xlu1 %1758 }
  0xa9   : > { %v1769_v49 = vsub.f32 %v1752_v42, %v1759_v28  ;;  %v1770_v40 = vsub.f32 %v1756_v43, %v1759_v28  ;;  %v1715_v62 = vpop.permute.xlu0 %1714 }
  0xaa   : > { %v1723_v10 = vsub.f32 %v1704_v20, %v1715_v62  ;;  %v1724_v26 = vsub.f32 %v1708_v21, %v1715_v62 }
  0xab   : > { %v1775_v53 = vand.u32 2147483647, %v1769_v49  ;;  %v1776_v44 = vand.u32 2147483647, %v1770_v40 }
  0xac   : > { %v1767_v55 = vpop.permute.xlu1 %1766  ;;  %v1729_v63 = vand.u32 2147483647, %v1723_v10  ;;  %v1730_v7 = vand.u32 2147483647, %v1724_v26 }
  0xad   : > { %v1781_v61 = vadd.f32 %v1775_v53, %v1733_v50  ;;  %v1782_v14 = vadd.f32 %v1776_v44, %v1734_v52  ;;  %v1773_v15 = vsub.f32 %v1752_v42, %v1767_v55  ;;  %v1774_v19 = vsub.f32 %v1756_v43, %v1767_v55 }
  0xae   : > { %v1763_v13 = vpop.permute.xlu0 %1762  ;;  %v1735_v48 = vadd.f32 %v1729_v63, %v1687_v29  ;;  %v1736_v51 = vadd.f32 %v1730_v7, %v1688_v30 }
  0xaf   : > { %v1787_v4 = vmul.f32 %v2599_v11, %v1781_v61  ;;  %v1788_v3 = vmul.f32 %v2604_v12, %v1782_v14  ;;  %v1771_v11 = vsub.f32 %v1752_v42, %v1763_v13  ;;  %v1772_v54 = vsub.f32 %v1756_v43, %v1763_v13 }
  0xb0   : > { %v1731_v12 = vand.u32 2147483647, %v1725_v18  ;;  %v1779_v32 = vand.u32 2147483647, %v1773_v15  ;;  %v1780_v28 = vand.u32 2147483647, %v1774_v19 }
  0xb1   : > { %v2963_v16 = vadd.f32 %v1788_v3, %v1787_v4  ;;  %v1777_v20 = vand.u32 2147483647, %v1771_v11  ;;  %v1778_v58 = vand.u32 2147483647, %v1772_v54 }
  0xb3   : > { %v1783_v35 = vadd.f32 %v1777_v20, %v1735_v48  ;;  %v1784_v36 = vadd.f32 %v1778_v58, %v1736_v51 }
  0xb5   : > { %v1789_v39 = vmul.f32 %v2639_v23, %v1783_v35  ;;  %v1790_v41 = vmul.f32 %v2634_v22, %v1784_v36 }
  0xb7   : > { %v2969_v43 = vadd.f32 %v1790_v41, %v1789_v39 }
  0xde   : > { %v2965_v8 = vpop.xlane.xlu1 %1849 }
  0xdf   : > { %vm1897_vm9 = vcmp.gt.f32.partialorder %v2965_v8, 0.0 }
  0xe4   : > { %v1677_v57 = vpop.permute.xlu1 %1676 }
  0xe5   : > { %v1683_v1 = vsub.f32 %v1659_v2, %v1677_v57  ;;  %v1684_v21 = vsub.f32 %v1663_v9, %v1677_v57  ;;  %v1836_v9 = vld [vmem:[#allocation5 + $0x10] sm:$0xf] }
  0xe7   : > { %v1689_v37 = vand.u32 2147483647, %v1683_v1  ;;  %v1690_v38 = vand.u32 2147483647, %v1684_v21 }
  0xe9   : > { %v1737_v45 = vadd.f32 %v1731_v12, %v1689_v37  ;;  %v1738_v42 = vadd.f32 %v1732_v56, %v1690_v38  ;;  %v1805_v37 = vld [vmem:[#allocation2] sm:$0xff] }
  0xeb   : > { %v1785_v46 = vadd.f32 %v1779_v32, %v1737_v45  ;;  %v1786_v47 = vadd.f32 %v1780_v28, %v1738_v42 }
  0xed   : > { %v1791_v49 = vmul.f32 %v2667_v34, %v1785_v46  ;;  %v1792_v2 = vmul.f32 %v2662_v33, %v1786_v47  ;;  %v1806_v47 = vld [vmem:[#allocation2 + $0x8] sm:$0xff] }
  0xef   : > { %v1795_v40 = vadd.f32 %v1792_v2, %v1791_v49 }
  0xf1   : > { %v1839_v50 = vadd.f32 %v1836_v9, %v1795_v40 }
  0xf3   : > { %1842 = vst [vmem:[#allocation5 + $0x10] sm:$0xf] %v1839_v50 }
 0x115   : > { %v552_v52 = vpop.f32.mrb[0].mxu0 }
 0x116   : > { %v554_v53 = vpop.f32.mrb[1].mxu0 }
 0x117   : > { %v1807_v53 = vld [vmem:[#allocation2 + $0x10] sm:$0xf] }
 0x119   : > { %v567_v44 = vpop.f32.mrb[2].mxu0 }
 0x11a   : > { %v569_v23 = vpop.f32.mrb[3].mxu0 }
 0x11d   : > { %v664_v55 = vpop.f32.mrb[0].mxu1  ;;  %v582_v22 = vpop.f32.mrb[4].mxu0 }
 0x11e   : > { %v665_v59 = vadd.f32 %v664_v55, %v552_v52  ;;  %v666_v60 = vpop.f32.mrb[1].mxu1  ;;  %v584_v61 = vpop.f32.mrb[5].mxu0 }
 0x121   : > { %v671_v14 = vpop.f32.mrb[2].mxu1  ;;  %v756_v62 = vpop.f32.mrb[6].mxu0 }
 0x122   : > { %v672_v4 = vadd.f32 %v671_v14, %v567_v44  ;;  %v757_v3 = vadd.f32 %v756_v62, %v665_v59  ;;  %v673_v34 = vpop.f32.mrb[3].mxu1  ;;  %v758_v10 = vpop.f32.mrb[7].mxu0 }
 0x125   : > { %v678_v33 = vpop.f32.mrb[4].mxu1  ;;  %v765_v26 = vpop.f32.mrb[8].mxu0 }
 0x126   : > { %v679_v18 = vadd.f32 %v678_v33, %v582_v22  ;;  %v766_v29 = vadd.f32 %v765_v26, %v672_v4  ;;  %v680_v30 = vpop.f32.mrb[5].mxu1  ;;  %v767_v27 = vpop.f32.mrb[9].mxu0 }
 0x129   : > { %v774_v63 = vpop.f32.mrb[10].mxu0  ;;  %v852_v7 = vpop.f32.mrb[6].mxu1 }
 0x12a   : > { %v775_v13 = vadd.f32 %v774_v63, %v679_v18  ;;  %v853_v15 = vadd.f32 %v852_v7, %v757_v3  ;;  %v854_v19 = vpop.f32.mrb[7].mxu1  ;;  %v776_v48 = vpop.f32.mrb[11].mxu0 }
 0x12d   : > { %v863_v51 = vpop.f32.mrb[8].mxu1  ;;  %v952_v11 = vpop.f32.mrb[12].mxu0 }
 0x12e   : > { %v864_v54 = vadd.f32 %v863_v51, %v766_v29  ;;  %v953_v12 = vadd.f32 %v952_v11, %v853_v15  ;;  %v865_v56 = vpop.f32.mrb[9].mxu1  ;;  %v954_v57 = vpop.f32.mrb[13].mxu0 }
 0x131   : > { %v874_v20 = vpop.f32.mrb[10].mxu1  ;;  %v959_v58 = vpop.f32.mrb[14].mxu0 }
 0x132   : > { %v875_v1 = vadd.f32 %v874_v20, %v775_v13  ;;  %v960_v21 = vadd.f32 %v959_v58, %v864_v54  ;;  %v876_v32 = vpop.f32.mrb[11].mxu1  ;;  %v961_v28 = vpop.f32.mrb[15].mxu0 }
 0x135   : > { %v966_v35 = vpop.f32.mrb[16].mxu0  ;;  %v1040_v36 = vpop.f32.mrb[12].mxu1 }
 0x136   : > { %v967_v38 = vadd.f32 %v966_v35, %v875_v1  ;;  %v1041_v39 = vadd.f32 %v1040_v36, %v953_v12  ;;  %v1042_v41 = vpop.f32.mrb[13].mxu1  ;;  %v968_v45 = vpop.f32.mrb[17].mxu0 }
 0x138   : > { %v1808_v42 = vadd.f32 %v1805_v37, %v1041_v39 }
 0x139   : > { %v1047_v46 = vpop.f32.mrb[14].mxu1  ;;  %v1139_v49 = vpop.f32.mrb[18].mxu0 }
 0x13a   : > { %1812 = vst.msk [vmem:[#allocation2] sm:$0xff] %vm356_vm7, %v1808_v42  ;;  %v1048_v2 = vadd.f32 %v1047_v46, %v960_v21  ;;  %v1049_v9 = vpop.f32.mrb[15].mxu1  ;;  %v1141_v40 = vpop.f32.mrb[19].mxu0 }
 0x13c   : > { %v1809_v50 = vadd.f32 %v1806_v47, %v1048_v2  ;;  %v1816_v2 = vld [vmem:[#allocation3] sm:$0xff] }
 0x13d   : > { %v1054_v52 = vpop.f32.mrb[16].mxu1  ;;  %v1154_v44 = vpop.f32.mrb[20].mxu0 }
 0x13e   : > { %1813 = vst.msk [vmem:[#allocation2 + $0x8] sm:$0xff] %vm356_vm7, %v1809_v50  ;;  %v1055_v23 = vadd.f32 %v1054_v52, %v967_v38  ;;  %v1056_v55 = vpop.f32.mrb[17].mxu1  ;;  %v1156_v22 = vpop.f32.mrb[21].mxu0 }
 0x140   : > { %v1810_v59 = vadd.f32 %v1807_v53, %v1055_v23  ;;  %v1817_v23 = vld [vmem:[#allocation3 + $0x8] sm:$0xff] }
 0x141   : > { %v1251_v60 = vpop.f32.mrb[18].mxu1  ;;  %v1169_v61 = vpop.f32.mrb[22].mxu0  ;;  %v1867_v14 = vld [vmem:[#allocation2] sm:$0xff] }
 0x142   : > { %1815 = vst.msk [vmem:[#allocation2 + $0x10] sm:$0xf] %vm359_vm8, %v1810_v59  ;;  %v1252_v62 = vadd.f32 %v1251_v60, %v1139_v49  ;;  %v1253_v4 = vpop.f32.mrb[19].mxu1  ;;  %v1171_v3 = vpop.f32.mrb[23].mxu0  ;;  %v1870_v34 = vmul.f32 %v1867_v14, %v2619_v17 }
 0x144   : > { %v1873_v10 = vsel %vm356_vm7, %v1870_v34, 0.0 }
 0x145   : > { %v1258_v33 = vpop.f32.mrb[20].mxu1  ;;  %v1343_v26 = vpop.f32.mrb[24].mxu0  ;;  %1874 = vadd.xlane.f32.xlu1 %v1873_v10  ;;  %v1868_v18 = vld [vmem:[#allocation2 + $0x8] sm:$0xff] }
 0x146   : > { %v1259_v29 = vadd.f32 %v1258_v33, %v1154_v44  ;;  %v1344_v30 = vadd.f32 %v1343_v26, %v1252_v62  ;;  %v1260_v27 = vpop.f32.mrb[21].mxu1  ;;  %v1345_v63 = vpop.f32.mrb[25].mxu0  ;;  %v1871_v7 = vmul.f32 %v1868_v18, %v2643_v25 }
 0x148   : > { %v1876_v13 = vsel %vm356_vm7, %v1871_v7, 0.0 }
 0x149   : > { %v1265_v15 = vpop.f32.mrb[22].mxu1  ;;  %v1352_v19 = vpop.f32.mrb[26].mxu0  ;;  %1877 = vadd.xlane.f32.xlu0 %v1876_v13  ;;  %v1869_v34 = vld [vmem:[#allocation2 + $0x10] sm:$0xf] }
 0x14a   : > { %v1266_v48 = vadd.f32 %v1265_v15, %v1169_v61  ;;  %v1353_v51 = vadd.f32 %v1352_v19, %v1259_v29  ;;  %v1267_v11 = vpop.f32.mrb[23].mxu1  ;;  %v1354_v54 = vpop.f32.mrb[27].mxu0  ;;  %v1818_v61 = vld [vmem:[#allocation3 + $0x10] sm:$0xf]  ;;  %v1872_v26 = vmul.f32 %v1869_v34, %v2641_v24 }
 0x14b   : > { %v1913_v19 = vpop.permute.xlu1 %1912 }
 0x14c   : > { %v1879_v27 = vsel %vm359_vm8, %v1872_v26, 0.0 }
 0x14d   : > { %v1361_v12 = vpop.f32.mrb[28].mxu0  ;;  %v1439_v56 = vpop.f32.mrb[24].mxu1 }
 0x14e   : > { %v1362_v57 = vadd.f32 %v1361_v12, %v1266_v48  ;;  %v1440_v20 = vadd.f32 %v1439_v56, %v1344_v30  ;;  %v1441_v58 = vpop.f32.mrb[25].mxu1  ;;  %v1363_v1 = vpop.f32.mrb[29].mxu0 }
 0x14f   : > { %v1921_v58 = vadd.f32 %v1913_v19, %v2832_v31 }
 0x151   : > { %v1450_v21 = vpop.f32.mrb[26].mxu1  ;;  %v1539_v32 = vpop.f32.mrb[30].mxu0 }
 0x152   : > { %v1451_v28 = vadd.f32 %v1450_v21, %v1353_v51  ;;  %v1540_v35 = vadd.f32 %v1539_v32, %v1440_v20  ;;  %v1452_v36 = vpop.f32.mrb[27].mxu1  ;;  %v1541_v37 = vpop.f32.mrb[31].mxu0 }
 0x153   : > { %v1917_v51 = vpop.permute.xlu1 %1916  ;;  %v1900_v36 = vmax.f32 %v2965_v8, 1.0 }
 0x155   : > { %v1461_v38 = vpop.f32.mrb[28].mxu1  ;;  %v1546_v39 = vpop.f32.mrb[32].mxu0 }
 0x156   : > { %v1462_v41 = vadd.f32 %v1461_v38, %v1362_v57  ;;  %v1547_v45 = vadd.f32 %v1546_v39, %v1451_v28  ;;  %v1463_v42 = vpop.f32.mrb[29].mxu1  ;;  %v1548_v46 = vpop.f32.mrb[33].mxu0 }
 0x157   : > { %v1927_v57 = vpop.permute.xlu1 %1926 }
 0x159   : > { %v1553_v47 = vpop.f32.mrb[34].mxu0  ;;  %v1627_v49 = vpop.f32.mrb[30].mxu1 }
 0x15a   : > { %v1554_v9 = vadd.f32 %v1553_v47, %v1462_v41  ;;  %v1628_v40 = vadd.f32 %v1627_v49, %v1540_v35  ;;  %v1629_v50 = vpop.f32.mrb[31].mxu1  ;;  %v1555_v52 = vpop.f32.mrb[35].mxu0 }
 0x15c   : > { %v1819_v53 = vadd.f32 %v1816_v2, %v1628_v40  ;;  %v1923_v40 = vadd.f32 %v1917_v51, %v2921_v5 }
 0x15d   : > { %v1634_v44 = vpop.f32.mrb[32].mxu1 }
 0x15e   : > { %1822 = vst.msk [vmem:[#allocation3] sm:$0xff] %vm356_vm7, %v1819_v53  ;;  %v1635_v55 = vadd.f32 %v1634_v44, %v1547_v45  ;;  %v1636_v22 = vpop.f32.mrb[33].mxu1 }
 0x160   : > { %v1820_v59 = vadd.f32 %v1817_v23, %v1635_v55 }
 0x161   : > { %v1641_v60 = vpop.f32.mrb[34].mxu1 }
 0x162   : > { %1823 = vst.msk [vmem:[#allocation3 + $0x8] sm:$0xff] %vm356_vm7, %v1820_v59  ;;  %v1642_v14 = vadd.f32 %v1641_v60, %v1554_v9  ;;  %v1643_v62 = vpop.f32.mrb[35].mxu1 }
 0x164   : > { %v1821_v4 = vadd.f32 %v1818_v61, %v1642_v14 }
 0x165   : > { %v1882_v3 = vld [vmem:[#allocation3] sm:$0xff] }
 0x166   : > { %1824 = vst.msk [vmem:[#allocation3 + $0x10] sm:$0xf] %vm359_vm8, %v1821_v4  ;;  %v1885_v10 = vmul.f32 %v1882_v3, %v2619_v17  ;;  %v1859_v17 = vld [vmem:[#allocation5 + $0x10] sm:$0xf] }
 0x167   : > { %v1864_v15 = vsel %vm1853_vm6, %v1859_v17, 0.0 }
 0x168   : > { %v1888_v33 = vsel %vm356_vm7, %v1885_v10, 0.0 }
 0x169   : > { %1889 = vadd.xlane.f32.xlu1 %v1888_v33  ;;  %v1883_v18 = vld [vmem:[#allocation3 + $0x8] sm:$0xff] }
 0x16a   : > { %v1886_v29 = vmul.f32 %v1883_v18, %v2643_v25  ;;  %v2996_v25 = vpop.xlane.xlu0 %1851 }
 0x16b   : > { %vm1898_vm10 = vcmp.gt.f32.partialorder %v2996_v25, 0.0  ;;  %v1901_v28 = vmax.f32 %v2996_v25, 1.0 }
 0x16c   : > { %v1891_v30 = vsel %vm356_vm7, %v1886_v29, 0.0 }
 0x16d   : > { %1892 = vadd.xlane.f32.xlu0 %v1891_v30  ;;  %1880 = vadd.xlane.f32.xlu1 %v1879_v27  ;;  %v1884_v63 = vld [vmem:[#allocation3 + $0x10] sm:$0xf]  ;;  %2344 = vrcp.f32 %v1901_v28 }
 0x16e   : > { %v1887_v7 = vmul.f32 %v1884_v63, %v2641_v24  ;;  %v2998_v48 = vpop.xlane.xlu0 %1855  ;;  %v2255_v24 = vsel %vm1897_vm9, 1.0, %v2470_v0  ;;  %2346 = vrcp.f32 %v1900_v36 }
 0x16f   : > { %vm1899_vm11 = vcmp.gt.f32.partialorder %v2998_v48, 0.0  ;;  %v1902_v45 = vmax.f32 %v2998_v48, 1.0 }
 0x170   : > { %v1894_v13 = vsel %vm359_vm8, %v1887_v7, 0.0 }
 0x171   : > { %1895 = vadd.xlane.f32.xlu0 %v1894_v13  ;;  %1860 = vadd.xlane.f32.xlu1 %v2963_v16  ;;  %v2256_v16 = vsel %vm1898_vm10, 1.0, %v2470_v0 }
 0x172   : > { %v1978_v11 = vadd.f32 %v2256_v16, %v2255_v24  ;;  %v1915_v12 = vpop.permute.xlu0 %1914 }
 0x173   : > { %v1922_v20 = vadd.f32 %v1915_v12, %v2927_v6 }
 0x175   : > { %1862 = vadd.xlane.f32.xlu1 %v2969_v43  ;;  %v2257_v43 = vsel %vm1899_vm11, 1.0, %v2470_v0  ;;  %v1934_v35 = vadd.f32 %v1927_v57, %v1922_v20 }
 0x176   : > { %v1979_v54 = vsel %vm1853_vm6, %v2257_v43, 0.0  ;;  %v1925_v21 = vpop.permute.xlu0 %1924 }
 0x177   : > { %v1980_v56 = vadd.f32 %v1979_v54, %v1978_v11  ;;  %v1933_v0 = vadd.f32 %v1925_v21, %v1921_v58  ;;  %v1937_v41 = vmax.f32 %v1934_v35, 1e-16  ;;  %v2345_v9 = vpop.eup %2344 }
 0x178   : > { %v2347_v23 = vpop.eup %2346 }
 0x179   : > { %1865 = vadd.xlane.f32.xlu1 %v1864_v15  ;;  %v1981_v1 = vrot.slane %v1980_v56, 4  ;;  %v1936_v6 = vmax.f32 %v1933_v0, 1e-16  ;;  %2348 = vrsqrt.f32 %v1937_v41 }
 0x17a   : > { %2350 = vrcp.f32 %v1902_v45 }
 0x17b   : > { %v1982_v37 = vadd.f32 %v1981_v1, %v1980_v56  ;;  %2352 = vrsqrt.f32 %v1936_v6 }
 0x17d   : > { %v1983_v46 = vrot.slane %v1982_v37, 2 }
 0x17f   : > { %v1984_v2 = vadd.f32 %v1983_v46, %v1982_v37 }
 0x181   : > { %v1985_v44 = vrot.slane %v1984_v2, 1 }
 0x183   : > { %v2349_v14 = vpop.eup %2348 }
 0x184   : > { %v2351_v4 = vpop.eup %2350 }
 0x185   : > { %v2353_v26 = vpop.eup %2352 }
 0x187   : > { %1928 = vrot.lane.b32.xlu0 %v2921_v5, %s2476_s9  ;;  %v1986_v5 = vadd.f32 %v1985_v44, %v1984_v2 }
 0x189   : > { %v1987_v15 = vmax.f32 %v1986_v5, 1.0  ;;  %vm1989_vm4 = vcmp.gt.f32.partialorder %v1986_v5, 0.0 }
 0x1d2   : > { %v1875_v32 = vpop.xlane.xlu1 %1874 }
 0x1d3   : > { %v1948_v3 = vmul.f32 %v2347_v23, %v1875_v32 }
 0x1d5   : > { %v1951_v13 = vmul.f32 %v2353_v26, %v1948_v3 }
 0x1d6   : > { %v1878_v38 = vpop.xlane.xlu0 %1877 }
 0x1d7   : > { %v1949_v59 = vmul.f32 %v2345_v9, %v1878_v38 }
 0x1d9   : > { %v1952_v29 = vmul.f32 %v2349_v14, %v1949_v59 }
 0x1f6   : > { %v1890_v39 = vpop.xlane.xlu1 %1889 }
 0x1f7   : > { %v1954_v60 = vmul.f32 %v2347_v23, %v1890_v39 }
 0x1f9   : > { %v1957_v30 = vmul.f32 %v2353_v26, %v1954_v60 }
 0x1fa   : > { %v1893_v42 = vpop.xlane.xlu0 %1892  ;;  %v1881_v31 = vpop.xlane.xlu1 %1880 }
 0x1fb   : > { %v1955_v50 = vmul.f32 %v2345_v9, %v1893_v42  ;;  %vm1960_vm13 = vcmp.gt.f32.partialorder %v1951_v13, %v1957_v30  ;;  %v1966_v43 = vsub.f32 %v1951_v13, %v1957_v30  ;;  %v1950_v54 = vmul.f32 %v2351_v4, %v1881_v31 }
 0x1fc   : > { %vm1963_vm15 = vmand %vm1897_vm9, %vm1960_vm13 }
 0x1fd   : > { %v1958_v34 = vmul.f32 %v2349_v14, %v1955_v50  ;;  %v1969_v20 = vsel %vm1963_vm15, %v1966_v43, 0.0 }
 0x1fe   : > { %v1896_v47 = vpop.xlane.xlu0 %1895  ;;  %v1861_v49 = vpop.xlane.xlu1 %1860  ;;  %v2002_v28 = vsel %vm2001_vm0, %v1969_v20, 0.0 }
 0x1ff   : > { %v1942_v61 = vmul.f32 %v2347_v23, %v1861_v49  ;;  %vm1961_vm12 = vcmp.gt.f32.partialorder %v1952_v29, %v1958_v34  ;;  %v1967_v24 = vsub.f32 %v1952_v29, %v1958_v34  ;;  %v1956_v12 = vmul.f32 %v2351_v4, %v1896_v47 }
 0x200   : > { %vm1964_vm14 = vmand %vm1898_vm10, %vm1961_vm12 }
 0x201   : > { %v1945_v27 = vsel %vm1897_vm9, %v1942_v61, 0.0  ;;  %v1970_v11 = vsel %vm1964_vm14, %v1967_v24, 0.0 }
 0x202   : > { %v1929_v52 = vpop.permute.xlu0 %1928  ;;  %v1863_v53 = vpop.xlane.xlu1 %1862  ;;  %v2003_v21 = vsel %vm2001_vm0, %v1970_v11, 0.0 }
 0x203   : > { %v1935_v55 = vadd.f32 %v1929_v52, %v1923_v40  ;;  %v1943_v22 = vmul.f32 %v2345_v9, %v1863_v53  ;;  %v2004_v35 = vadd.f32 %v2003_v21, %v2002_v28 }
 0x205   : > { %v1938_v62 = vmax.f32 %v1935_v55, 1e-16  ;;  %v1946_v10 = vsel %vm1898_vm10, %v1943_v22, 0.0 }
 0x206   : > { %v1866_v33 = vpop.xlane.xlu1 %1865  ;;  %v1990_v63 = vadd.f32 %v1946_v10, %v1945_v27 }
 0x207   : > { %2354 = vrsqrt.f32 %v1938_v62  ;;  %v1944_v18 = vmul.f32 %v2351_v4, %v1866_v33 }
 0x208   : > { %2356 = vrcp.f32 %v1987_v15 }
 0x209   : > { %v1947_v7 = vsel %vm1899_vm11, %v1944_v18, 0.0 }
 0x20a   : > { %v1991_v17 = vsel %vm1853_vm6, %v1947_v7, 0.0 }
 0x20b   : > { %v1992_v19 = vadd.f32 %v1991_v17, %v1990_v63 }
 0x20d   : > { %v1993_v16 = vrot.slane %v1992_v19, 4 }
 0x20f   : > { %v1994_v51 = vadd.f32 %v1993_v16, %v1992_v19 }
 0x211   : > { %v2355_v56 = vpop.eup %2354  ;;  %v1995_v57 = vrot.slane %v1994_v51, 2 }
 0x212   : > { %v1953_v58 = vmul.f32 %v2355_v56, %v1950_v54  ;;  %v1959_v1 = vmul.f32 %v2355_v56, %v1956_v12  ;;  %v2357_v38 = vpop.eup %2356 }
 0x213   : > { %v1996_v25 = vadd.f32 %v1995_v57, %v1994_v51 }
 0x214   : > { %vm1962_vm1 = vcmp.gt.f32.partialorder %v1953_v58, %v1959_v1  ;;  %v1968_v32 = vsub.f32 %v1953_v58, %v1959_v1 }
 0x215   : > { %vm1965_vm3 = vmand %vm1899_vm11, %vm1962_vm1  ;;  %v1997_v8 = vrot.slane %v1996_v25, 1 }
 0x216   : > { %v1971_v36 = vsel %vm1965_vm3, %v1968_v32, 0.0 }
 0x217   : > { %v2006_v0 = vsel %vm2005_vm2, %v1971_v36, 0.0  ;;  %v1998_v37 = vadd.f32 %v1997_v8, %v1996_v25 }
 0x218   : > { %v2007_v39 = vadd.f32 %v2006_v0, %v2004_v35 }
 0x219   : > { %v1999_v41 = vmul.f32 %v2357_v38, %v1998_v37 }
 0x21a   : > { %v2008_v45 = vrot.slane %v2007_v39, 4 }
 0x21b   : > { %v2000_v6 = vsel %vm1989_vm4, %v1999_v41, 0.0 }
 0x21c   : > { %v2009_v42 = vadd.f32 %v2008_v45, %v2007_v39  ;;  %2016 = vst [vmem:[%s310_s11] sm:$0x1] %v2000_v6 }
 0x21e   : > { %v2010_v48 = vrot.slane %v2009_v42, 2 }
 0x220   : > { %v2011_v31 = vadd.f32 %v2010_v48, %v2009_v42 }
 0x222   : > { %v2012_v46 = vrot.slane %v2011_v31, 1 }
 0x224   : > { %v2013_v47 = vadd.f32 %v2012_v46, %v2011_v31 }
 0x226   : > { %v2014_v49 = vmul.f32 %v2357_v38, %v2013_v47 }
 0x228   : > { %v2015_v2 = vsel %vm1989_vm4, %v2014_v49, 0.0 }
 0x229   : > { %2019 = vperm.xlu1 %2338, %v2015_v2  }
 0x22a   : > { %2371 = shalt.err (!%p2368_p5)
}
 0x22b   : > { %s2372_s7 = scalar_lea.hbm %s3042_s15, 16  ;;  %s2376_s11 = scalar_lea.hbm %s3120_s4, 32 }
 0x22c   : > { %p2373_p6 = scmp.ne.s32.totalorder %s3042_s15, %s2372_s7  ;;  %p2377_p10 = scmp.lt.u32.totalorder %s3042_s15, %s3120_s4 }
 0x22d   : > { %p2378_p11 = scmp.lt.u32.totalorder %s2376_s11, %s2372_s7  ;;  %p2380_p13 = scmp.lt.u32.totalorder %s2372_s7, %s3042_s15 }
 0x22e   : > { %p2374_p7 = pnand %p2373_p6, %p2549_p4 }
 0x22f   : > { %p2379_p12 = por %p2378_p11, %p2377_p10 }
 0x230   : > { %p2375_p9 = pneg %p2374_p7 }
 0x231   : > { %p2381_p0 = por %p2380_p13, %p2379_p12 }
 0x233   : > { %p2382_p1 = pnand %p2381_p0, %p2375_p9 }
 0x235   : > { %2385 = shalt.err (!%p2382_p1)
}
 0x236   : > { %2266 = dma.vmem_to_hbm [thread:$0]  (%p2549_p4), %s2041_s16, 16, %s3042_s15, %s2024_s17  }
 0x237   : > { %s316_s24 = scalar_lea.vmem [#allocation8], %s3033_s10  ;;  %s3070_s7 = scalar_lea.hbm %s3121_s5, %s2258_s12 }
 0x238   : > { %s2053_s25 = sshll.u32 %s316_s24, 4  ;;  %s2028_s8 = scalar_lea.sflag [#allocation9], %s3033_s10  ;;  %s3063_s25 = int_to_ptr.vmem [resolvable:$true] %s2053_s25 }
 0x239   : > { %s2386_s9 = scalar_lea.vmem %s3063_s25, 16  ;;  %s2478_s15 = smov [#allocation8]  }
 0x23a   : > { %p2387_p2 = scmp.ne.s32.totalorder %s3063_s25, %s2386_s9  ;;  %s2390_s16 = sshll.u32 %s2478_s15, 4  ;;  %s2391_s16 = int_to_ptr.vmem [resolvable:$false] %s2390_s16 }
 0x23b   : > { %s2392_s21 = scalar_lea.vmem %s2391_s16, 32  ;;  %p2393_p6 = scmp.lt.s32.totalorder %s3063_s25, %s2391_s16 }
 0x23c   : > { %p2388_p3 = pnand %p2387_p2, %p2549_p4  ;;  %p2394_p7 = scmp.lt.s32.totalorder %s2392_s21, %s2386_s9 }
 0x23e   : > { %p2389_p5 = pneg %p2388_p3  ;;  %p2395_p9 = por %p2394_p7, %p2393_p6 }
 0x240   : > { %p2396_p10 = pnand %p2395_p9, %p2389_p5 }
 0x2a8   : > { %v2020_v9 = vpop.permute.xlu1 %2019 }
 0x2a9   : > { %2022 = vst [vmem:[%s316_s24] sm:$0x1] %v2020_v9 }
 0x2aa   : > { %2399 = shalt.err (!%p2396_p10)
}
 0x2ab   : > { %s2400_s10 = scalar_lea.hbm %s3070_s7, 16  ;;  %s2404_s11 = scalar_lea.hbm %s3121_s5, 32 }
 0x2ac   : > { %p2401_p11 = scmp.ne.s32.totalorder %s3070_s7, %s2400_s10  ;;  %p2405_p0 = scmp.lt.u32.totalorder %s3070_s7, %s3121_s5 }
 0x2ad   : > { %p2406_p1 = scmp.lt.u32.totalorder %s2404_s11, %s2400_s10  ;;  %p2408_p3 = scmp.lt.u32.totalorder %s2400_s10, %s3070_s7 }
 0x2ae   : > { %p2402_p12 = pnand %p2401_p11, %p2549_p4 }
 0x2af   : > { %p2407_p2 = por %p2406_p1, %p2405_p0 }
 0x2b0   : > { %p2403_p13 = pneg %p2402_p12 }
 0x2b1   : > { %p2409_p5 = por %p2408_p3, %p2407_p2 }
 0x2b3   : > { %p2410_p6 = pnand %p2409_p5, %p2403_p13 }
 0x2b5   : > { %2413 = shalt.err (!%p2410_p6)
}
 0x2b6   : > { %2267 = dma.vmem_to_hbm [thread:$0]  (%p2549_p4), %s3063_s25, 16, %s3070_s7, %s2028_s8  }
 0x2b7 PF: > { %p2277_p7 = scmp.ge.s32.totalorder %s2468_s23, 2  ;;  %s2065_s24 = sand.u32 1, %s2448_s18  }
 0x2b8   : > { %s2066_s27 = scalar_lea.sflag [#allocation7], %s2065_s24 }
 0x2b9   : > { %p2271_p9 = pnand %p2277_p7, %p2556_p8 }
 0x2bb   : > { %2439 = dma.done.wait (!%p2271_p9), %s2066_s27, 16  }
 0x2bc   : > { %2441 = vsyncadd (!%p2271_p9), %s2066_s27, 4294967280  ;;  %s2074_s29 = scalar_lea.sflag [#allocation9], %s2065_s24 }
 0x2bd   : > { %2443 = dma.done.wait (!%p2271_p9), %s2074_s29, 16  }
 0x2be   : > { %2445 = vsyncadd (!%p2271_p9), %s2074_s29, 4294967280  ;;  %s22_s23 = sadd.s32 1, %s2468_s23   ;;  %s3124_s18 = smov %s2452_s19 }
 0x2bf   : > { %p19_p10 = scmp.ge.s32.totalorder %s22_s23, 4   ;;  %s3125_s19 = smov %s2456_s20 }
 0x2c0   : > { %s3126_s20 = smov %s2562_s6  ;;  %s3127_s21 = smov %s2464_s22 }
 0x2c1   : > { %s3128_s22 = smov %s3130_s26  ;;  %21 = sbr.rel (!%p19_p10) target bundleno = 6 (0x6), region = 105 }
 0x2c8   :  { %2078 = vsyncpa [#allocation7], 1 }
 0x2c9   :  { %2080 = vsyncpa [#allocation7 + $0x1], 1 }
 0x2ca   :  { %2081 = vsyncpa [#allocation9], 1 }
 0x2cb   :  { %2083 = vsyncpa [#allocation9 + $0x1], 1 }

</bundles_post_ra>
